<compile_context>
chip_gen: v5e
topology: v5e:2x2
jax: 0.10.0
libtpu: 0.0.40
codegen_flags: <defaults>
</compile_context>

<pallas_src>
import math
from functools import partial

import jax
import jax.numpy as jnp
from jax.experimental import pallas as pl
from jax.experimental.pallas import tpu as pltpu

LANE = 128
NEG_SLOPE = 0.01  # F.leaky_relu default


# ----------------------------- helpers --------------------------------------

def _round_up(x, m):
    return ((x + m - 1) // m) * m


def _pad_last(x, target):
    pad = target - x.shape[-1]
    if pad == 0:
        return x
    return jnp.pad(x, [(0, 0)] * (x.ndim - 1) + [(0, pad)])


def _bilinear_matrix(out_size, in_size):
    """(out_size, in_size) interpolation matrix, bilinear, align_corners=True."""
    if in_size == 1:
        return jnp.ones((out_size, 1), jnp.float32)
    src = jnp.arange(out_size, dtype=jnp.float32) * (
        float(in_size - 1) / float(out_size - 1))
    lo = jnp.floor(src).astype(jnp.int32)
    hi = jnp.minimum(lo + 1, in_size - 1)
    frac = src - lo.astype(jnp.float32)
    rows = jnp.arange(out_size)
    m = jnp.zeros((out_size, in_size), jnp.float32)
    m = m.at[rows, lo].add(1.0 - frac)
    m = m.at[rows, hi].add(frac)
    return m


def _bilinear_matrix_padded(out_size, in_size):
    # Zero rows at top/bottom fold the 3x3 conv's zero padding into the
    # interpolation itself.
    return jnp.pad(_bilinear_matrix(out_size, in_size), ((1, 1), (0, 0)))


# ----------------------------- Pallas kernels -------------------------------

def _pointwise_kernel(x_ref, w_ref, scale_ref, shift_ref, o_ref, *, neg_slope):
    # x_ref: (TM, Cp)  w_ref: (Cp, Op)  scale/shift: (1, Op)  o_ref: (TM, Op)
    acc = jnp.dot(x_ref[...], w_ref[...],
                  preferred_element_type=jnp.float32,
                  precision=jax.lax.Precision.HIGHEST)
    acc = acc * scale_ref[...] + shift_ref[...]
    acc = jnp.where(acc >= 0.0, acc, acc * neg_slope)
    o_ref[...] = acc.astype(o_ref.dtype)


def _conv3x3_kernel(x_ref, w_ref, scale_ref, shift_ref, o_ref, *, oh, ow,
                    neg_slope):
    # x_ref: (1, oh+2, ow+2, Cp) zero-padded NHWC image
    # w_ref: (9, Cp, Op) taps (kh*3+kw)   scale/shift: (1, Op)
    # o_ref: (1, oh*ow, Op)
    cp = w_ref.shape[1]
    op = w_ref.shape[2]
    acc = jnp.zeros((oh * ow, op), jnp.float32)
    for kh in range(3):          # static unroll: in-kernel im2col, 9 MXU passes
        for kw in range(3):
            xs = x_ref[0, kh:kh + oh, kw:kw + ow, :]        # (oh, ow, Cp)
            xs2 = xs.reshape(oh * ow, cp)                   # ow % 8 friendly
            acc = acc + jnp.dot(xs2, w_ref[kh * 3 + kw],
                                preferred_element_type=jnp.float32,
                                precision=jax.lax.Precision.HIGHEST)
    acc = acc * scale_ref[...] + shift_ref[...]
    acc = jnp.where(acc >= 0.0, acc, acc * neg_slope)
    o_ref[0] = acc.astype(o_ref.dtype)


# ----------------------------- kernel wrappers ------------------------------

def _pointwise_conv(x_nhwc, w_p, scale_p, shift_p, *, neg_slope=NEG_SLOPE):
    """Fused 1x1 conv + BN fold + LeakyReLU on channel-padded NHWC input."""
    n, h, w, cp = x_nhwc.shape
    op = w_p.shape[1]
    m = n * h * w
    x2d = x_nhwc.reshape(m, cp)

    # Row tile: up to 512, multiple of 8, and >= 2 parallel grid steps
    # (keeps both TCs busy on v7x, amortizes per-step overhead elsewhere).
    tm = min(512, max(8, (m // 2 // 8) * 8))
    m_pad = pl.cdiv(m, tm) * tm
    if m_pad != m:
        x2d = jnp.pad(x2d, ((0, m_pad - m), (0, 0)))

    out = pl.pallas_call(
        partial(_pointwise_kernel, neg_slope=neg_slope),
        out_shape=jax.ShapeDtypeStruct((m_pad, op), jnp.float32),
        grid_spec=pltpu.PrefetchScalarGridSpec(
            num_scalar_prefetch=0,
            grid=(m_pad // tm,),
            in_specs=[
                pl.BlockSpec((tm, cp), lambda i: (i, 0)),
                # constant index_map -> the weight / scale / shift blocks are
                # DMA'd once and stay resident across grid steps.
                pl.BlockSpec((cp, op), lambda i: (0, 0)),
                pl.BlockSpec((1, op), lambda i: (0, 0)),
                pl.BlockSpec((1, op), lambda i: (0, 0)),
            ],
            out_specs=pl.BlockSpec((tm, op), lambda i: (i, 0)),
        ),
        compiler_params=pltpu.CompilerParams(
            dimension_semantics=("parallel",)),
        cost_estimate=pl.CostEstimate(
            flops=2 * m_pad * cp * op,
            transcendentals=0,
            bytes_accessed=4 * (m_pad * cp + cp * op + m_pad * op)),
    )(x2d, w_p, scale_p, shift_p)

    if m_pad != m:
        out = out[:m]
    return out.reshape(n, h, w, op)


def _conv3x3(xpad_nhwc, w_taps, scale_p, shift_p, *, neg_slope=NEG_SLOPE):
    """Fused 3x3 VALID conv (on pre-zero-padded NHWC) + BN fold + LeakyReLU."""
    n, hp2, wp2, cp = xpad_nhwc.shape
    oh, ow = hp2 - 2, wp2 - 2
    op = w_taps.shape[-1]

    out = pl.pallas_call(
        partial(_conv3x3_kernel, oh=oh, ow=ow, neg_slope=neg_slope),
        out_shape=jax.ShapeDtypeStruct((n, oh * ow, op), jnp.float32),
        grid_spec=pltpu.PrefetchScalarGridSpec(
            num_scalar_prefetch=0,
            grid=(n,),
            in_specs=[
                pl.BlockSpec((1, hp2, wp2, cp), lambda i: (i, 0, 0, 0)),
                pl.BlockSpec((9, cp, op), lambda i: (0, 0, 0)),
                pl.BlockSpec((1, op), lambda i: (0, 0)),
                pl.BlockSpec((1, op), lambda i: (0, 0)),
            ],
            out_specs=pl.BlockSpec((1, oh * ow, op), lambda i: (i, 0, 0)),
        ),
        compiler_params=pltpu.CompilerParams(
            dimension_semantics=("parallel",)),
        cost_estimate=pl.CostEstimate(
            flops=2 * n * oh * ow * 9 * cp * op,
            transcendentals=0,
            bytes_accessed=4 * (n * hp2 * wp2 * cp + 9 * cp * op
                                + n * oh * ow * op)),
    )(xpad_nhwc, w_taps, scale_p, shift_p)

    return out.reshape(n, oh, ow, op)


# ------------------------------ DecoderBlock --------------------------------

class DecoderBlockPallas:
    """JAX/Pallas port of DecoderBlock (inference-mode BatchNorm fold)."""

    def __init__(self, in_channels, n_filters, key=jax.random.PRNGKey(0)):
        assert in_channels % 4 == 0
        c1 = in_channels // 4
        self.in_channels, self.n_filters, self.c1 = in_channels, n_filters, c1
        self.bn_eps = 1e-5
        self.neg_slope = NEG_SLOPE

        ks = jax.random.split(key, 8)

        def conv_w(k, oc, ic, kh, kw):
            bound = 1.0 / math.sqrt(ic * kh * kw)
            return jax.random.uniform(k, (oc, ic, kh, kw), minval=-bound,
                                      maxval=bound, dtype=jnp.float32)

        def conv_b(k, oc, ic, kh, kw):
            bound = 1.0 / math.sqrt(ic * kh * kw)
            return jax.random.uniform(k, (oc,), minval=-bound, maxval=bound,
                                      dtype=jnp.float32)

        def bn_params(k, c):
            kg, kb, km, kv = jax.random.split(k, 4)
            gamma = jax.random.uniform(kg, (c,), minval=0.5, maxval=1.5,
                                       dtype=jnp.float32)
            beta = 0.1 * jax.random.normal(kb, (c,), dtype=jnp.float32)
            mean = 0.1 * jax.random.normal(km, (c,), dtype=jnp.float32)
            var = jax.random.uniform(kv, (c,), minval=0.5, maxval=1.5,
                                     dtype=jnp.float32)
            return gamma, beta, mean, var

        # Raw parameters (PyTorch layouts) -- used by the reference check too.
        self.w1 = conv_w(ks[0], c1, in_channels, 1, 1)
        self.b1 = conv_b(ks[1], c1, in_channels, 1, 1)
        self.g1, self.be1, self.mu1, self.var1 = bn_params(ks[2], c1)

        self.w2 = conv_w(ks[3], c1, c1, 3, 3)              # Upsampling conv, bias=False
        self.g2, self.be2, self.mu2, self.var2 = bn_params(ks[4], c1)

        self.w3 = conv_w(ks[5], n_filters, c1, 1, 1)
        self.b3 = conv_b(ks[6], n_filters, c1, 1, 1)
        self.g3, self.be3, self.mu3, self.var3 = bn_params(ks[7], n_filters)

        # ---- pre-folded + lane-padded kernel parameters (computed once) ----
        self.cin_p = _round_up(in_channels, LANE)
        self.c1_p = _round_up(c1, LANE)
        self.nf_p = _round_up(n_filters, LANE)

        def fold(gamma, beta, mean, var, bias):
            scale = gamma / jnp.sqrt(var + self.bn_eps)
            shift = beta + scale * (bias - mean)
            return scale, shift

        s1, t1 = fold(self.g1, self.be1, self.mu1, self.var1, self.b1)
        s2, t2 = fold(self.g2, self.be2, self.mu2, self.var2,
                      jnp.zeros((c1,), jnp.float32))
        s3, t3 = fold(self.g3, self.be3, self.mu3, self.var3, self.b3)

        def pad_vec(v, n):
            return jnp.zeros((1, n), jnp.float32).at[0, :v.shape[0]].set(v)

        # conv1: (OC, IC, 1, 1) -> (IC_p, OC_p)
        w1m = self.w1.reshape(c1, in_channels).T
        self.w1_p = jnp.zeros((self.cin_p, self.c1_p),
                              jnp.float32).at[:in_channels, :c1].set(w1m)
        self.scale1_p = pad_vec(s1, self.c1_p)
        self.shift1_p = pad_vec(t1, self.c1_p)

        # conv2 (3x3): (OC, IC, KH, KW) -> (9, IC_p, OC_p), tap = kh*3 + kw
        w2t = jnp.transpose(self.w2, (2, 3, 1, 0)).reshape(9, c1, c1)
        self.w2_p = jnp.zeros((9, self.c1_p, self.c1_p),
                              jnp.float32).at[:, :c1, :c1].set(w2t)
        self.scale2_p = pad_vec(s2, self.c1_p)
        self.shift2_p = pad_vec(t2, self.c1_p)

        # conv3: (OC, IC, 1, 1) -> (IC_p, OC_p)
        w3m = self.w3.reshape(n_filters, c1).T
        self.w3_p = jnp.zeros((self.c1_p, self.nf_p),
                              jnp.float32).at[:c1, :n_filters].set(w3m)
        self.scale3_p = pad_vec(s3, self.nf_p)
        self.shift3_p = pad_vec(t3, self.nf_p)

    def __call__(self, x):
        n, cin, h, w = x.shape
        assert cin == self.in_channels
        hi = jax.lax.Precision.HIGHEST

        # NCHW -> NHWC once; channel-pad to lane width (padding stays zero
        # through the whole pipeline, so nothing is sliced between kernels).
        xp = _pad_last(jnp.transpose(x, (0, 2, 3, 1)), self.cin_p)

        # conv1 (1x1) + BN1 + LeakyReLU
        y1 = _pointwise_conv(xp, self.w1_p, self.scale1_p, self.shift1_p,
                             neg_slope=self.neg_slope)

        # Bilinear x2 upsample (align_corners=True), separable; the 3x3 conv's
        # zero spatial padding is folded into the interpolation matrices.
        ahp = _bilinear_matrix_padded(2 * h, h)      # (2h+2, h)
        awp = _bilinear_matrix_padded(2 * w, w)      # (2w+2, w)
        up = jnp.einsum('yh,nhwc,xw->nyxc', ahp, y1, awp, precision=hi)

        # 3x3 conv (bias=False) + BN2 + LeakyReLU, in-kernel im2col
        y2 = _conv3x3(up, self.w2_p, self.scale2_p, self.shift2_p,
                      neg_slope=self.neg_slope)

        # conv3 (1x1) + BN3 + LeakyReLU
        y3 = _pointwise_conv(y2, self.w3_p, self.scale3_p, self.shift3_p,
                             neg_slope=self.neg_slope)

        # drop channel padding, back to NCHW (single transpose at the boundary)
        return jnp.transpose(y3[..., :self.n_filters], (0, 3, 1, 2))


# ------------------------------ reference -----------------------------------

def _bilinear_up_ref(x, scale):
    """Gather-based bilinear x`scale` upsample, align_corners=True, NCHW."""
    n, c, h, w = x.shape
    oh, ow = h * scale, w * scale

    def coords(o, i):
        if i == 1:
            z = jnp.zeros((o,), jnp.int32)
            return z, z, jnp.zeros((o,), jnp.float32)
        src = jnp.arange(o, dtype=jnp.float32) * (float(i - 1) / float(o - 1))
        lo = jnp.floor(src).astype(jnp.int32)
        hi = jnp.minimum(lo + 1, i - 1)
        return lo, hi, src - lo.astype(jnp.float32)

    hlo, hhi, hf = coords(oh, h)
    wlo, whi, wf = coords(ow, w)
    top = (x[:, :, hlo, :] * (1.0 - hf)[None, None, :, None]
           + x[:, :, hhi, :] * hf[None, None, :, None])
    out = (top[:, :, :, wlo] * (1.0 - wf)[None, None, None, :]
           + top[:, :, :, whi] * wf[None, None, None, :])
    return out


def _reference_forward(x, m):
    hi = jax.lax.Precision.HIGHEST

    def conv(x, w, pad=0):
        return jax.lax.conv_general_dilated(
            x, w, (1, 1), ((pad, pad), (pad, pad)),
            dimension_numbers=("NCHW", "OIHW", "NCHW"), precision=hi)

    def bn(x, g, b, mu, var):
        inv = 1.0 / jnp.sqrt(var + m.bn_eps)
        return ((x - mu[None, :, None, None]) * (g * inv)[None, :, None, None]
                + b[None, :, None, None])

    def lrelu(x):
        return jnp.where(x >= 0, x, NEG_SLOPE * x)

    y = conv(x, m.w1) + m.b1[None, :, None, None]
    y = lrelu(bn(y, m.g1, m.be1, m.mu1, m.var1))
    y = _bilinear_up_ref(y, 2)
    y = conv(y, m.w2, pad=1)
    y = lrelu(bn(y, m.g2, m.be2, m.mu2, m.var2))
    y = conv(y, m.w3) + m.b3[None, :, None, None]
    y = lrelu(bn(y, m.g3, m.be3, m.mu3, m.var3))
    return y


# --------------------------------- main --------------------------------------

if __name__ == "__main__":
    key = jax.random.PRNGKey(0)
    k_x, k_p = jax.random.split(key)

    N, CIN, H, W = 2, 16, 16, 16
    NF = 8

    x = jax.random.normal(k_x, (N, CIN, H, W), dtype=jnp.float32)
    block = DecoderBlockPallas(CIN, NF, key=k_p)

    y = jax.block_until_ready(block(x))
    assert y.shape == (N, NF, 2 * H, 2 * W), y.shape

    ref = jax.block_until_ready(_reference_forward(x, block))
    max_err = float(jnp.max(jnp.abs(y - ref)))
    assert jnp.allclose(y, ref, atol=1e-3, rtol=1e-3), max_err

    print("KERNEL_OK")
</pallas_src>

<mosaic_0001>
module attributes {stable_mosaic.version = 11 : i64} {
  func.func @_pointwise_kernel(%arg0: i32, %arg1: memref<256x128xf32, #tpu.memory_space<vmem>>, %arg2: memref<128x128xf32, #tpu.memory_space<vmem>>, %arg3: memref<1x128xf32, #tpu.memory_space<vmem>>, %arg4: memref<1x128xf32, #tpu.memory_space<vmem>>, %arg5: memref<256x128xf32, #tpu.memory_space<vmem>>) attributes {dimension_semantics = [#tpu.dimension_semantics<parallel>], iteration_bounds = array<i64: 2>, scalar_prefetch = 0 : i64, scratch_operands = 0 : i64, tpu.core_type = #tpu.core_type<tc>, window_params = [{transform_indices = @transform_0, window_bounds = array<i64: 256, 128>}, {pipeline_mode = #tpu.pipeline_mode<synchronous>, transform_indices = @transform_1, window_bounds = array<i64: 128, 128>}, {pipeline_mode = #tpu.pipeline_mode<synchronous>, transform_indices = @transform_2, window_bounds = array<i64: 1, 128>}, {pipeline_mode = #tpu.pipeline_mode<synchronous>, transform_indices = @transform_3, window_bounds = array<i64: 1, 128>}, {transform_indices = @transform_4, window_bounds = array<i64: 256, 128>}]} {
    %c0 = arith.constant 0 : index
    %c0_0 = arith.constant 0 : index
    %0 = vector.load %arg1[%c0, %c0_0] : memref<256x128xf32, #tpu.memory_space<vmem>>, vector<256x128xf32>
    %c0_1 = arith.constant 0 : index
    %c0_2 = arith.constant 0 : index
    %1 = vector.load %arg2[%c0_1, %c0_2] : memref<128x128xf32, #tpu.memory_space<vmem>>, vector<128x128xf32>
    %cst = arith.constant dense<0.000000e+00> : vector<256x128xf32>
    %2 = tpu.matmul %0, %1, %cst {dimension_numbers = #tpu.dot_dimension_numbers<[1], [0], [0], [1], [0, 0, 1, 1], [], []>, precision = #tpu.contract_precision<fp32>} : vector<256x128xf32>, vector<128x128xf32>, vector<256x128xf32> -> vector<256x128xf32>
    %c0_3 = arith.constant 0 : index
    %c0_4 = arith.constant 0 : index
    %3 = vector.load %arg3[%c0_3, %c0_4] : memref<1x128xf32, #tpu.memory_space<vmem>>, vector<1x128xf32>
    %4 = vector.broadcast %3 : vector<1x128xf32> to vector<256x128xf32>
    %5 = arith.mulf %2, %4 : vector<256x128xf32>
    %c0_5 = arith.constant 0 : index
    %c0_6 = arith.constant 0 : index
    %6 = vector.load %arg4[%c0_5, %c0_6] : memref<1x128xf32, #tpu.memory_space<vmem>>, vector<1x128xf32>
    %7 = vector.broadcast %6 : vector<1x128xf32> to vector<256x128xf32>
    %8 = arith.addf %5, %7 : vector<256x128xf32>
    %cst_7 = arith.constant 0.000000e+00 : f32
    %9 = vector.broadcast %cst_7 : f32 to vector<256x128xf32>
    %10 = arith.cmpf oge, %8, %9 : vector<256x128xf32>
    %cst_8 = arith.constant 0.00999999977 : f32
    %11 = vector.broadcast %cst_8 : f32 to vector<256x128xf32>
    %12 = arith.mulf %8, %11 : vector<256x128xf32>
    %13 = arith.select %10, %8, %12 : vector<256x128xi1>, vector<256x128xf32>
    %c0_9 = arith.constant 0 : index
    %c0_10 = arith.constant 0 : index
    %14 = vector.load %arg5[%c0_9, %c0_10] : memref<256x128xf32, #tpu.memory_space<vmem>>, vector<256x128xf32>
    tpu.vector_store %arg5[%c0_9, %c0_10], %13 {strides = array<i32>} : memref<256x128xf32, #tpu.memory_space<vmem>>, vector<256x128xf32>,
    return
  }
  func.func @transform_0(%arg0: i32) -> (i32, i32) {
    %c0_i32 = arith.constant 0 : i32
    %c0_i32_0 = arith.constant 0 : i32
    return %arg0, %c0_i32 : i32, i32
  }
  func.func @transform_1(%arg0: i32) -> (i32, i32) {
    %c0_i32 = arith.constant 0 : i32
    %c0_i32_0 = arith.constant 0 : i32
    %c0_i32_1 = arith.constant 0 : i32
    return %c0_i32, %c0_i32_0 : i32, i32
  }
  func.func @transform_2(%arg0: i32) -> (i32, i32) {
    %c0_i32 = arith.constant 0 : i32
    %c0_i32_0 = arith.constant 0 : i32
    %c0_i32_1 = arith.constant 0 : i32
    return %c0_i32, %c0_i32_0 : i32, i32
  }
  func.func @transform_3(%arg0: i32) -> (i32, i32) {
    %c0_i32 = arith.constant 0 : i32
    %c0_i32_0 = arith.constant 0 : i32
    %c0_i32_1 = arith.constant 0 : i32
    return %c0_i32, %c0_i32_0 : i32, i32
  }
  func.func @transform_4(%arg0: i32) -> (i32, i32) {
    %c0_i32 = arith.constant 0 : i32
    %c0_i32_0 = arith.constant 0 : i32
    return %arg0, %c0_i32 : i32, i32
  }
}

</mosaic_0001>

<bundles_post_ra>
// kernel: tpu_custom_call.1
= control target key start
LH: loop header
LB: loop body
LE: loop exit
PB: predicated region body
PF: predicated region fallthrough
CT: control target
= control target key end

     0   :  { %9 = vsyncpa [#allocation3], 0  ;;  %s3332_s0 = inlined_call_operand.hbm [shape: f32[512,128], index: 0, kind: input, shape index: {}]   ;;  %s3333_s1 = inlined_call_operand.hbm [shape: f32[128,128], index: 1, kind: input, shape index: {}]   ;;  %s3334_s2 = inlined_call_operand.vmem [shape: f32[1,128], index: 2, kind: input, shape index: {}]   ;;  %s3335_s3 = inlined_call_operand.vmem [shape: f32[1,128], index: 3, kind: input, shape index: {}]   ;;  %s3336_s4 = inlined_call_operand.hbm [shape: f32[512,128], index: 4, kind: output, shape index: {}]  }
   0x1   :  { %11 = vsyncpa [#allocation3 + $0x1], 0 }
   0x2   :  { %12 = vsyncpa [#allocation6], 0 }
   0x3   :  { %13 = vsyncpa [#allocation4], 0 }
   0x4   :  { %15 = vsyncpa [#allocation4 + $0x1], 0  ;;  %s2161_s15 = smov 0   ;;  %s2163_s16 = smov 0  }
   0x5   :  { %s2165_s17 = smov 0   ;;  %s2167_s18 = smov 0  }
   0x6 LB: > { %s2182_s19 = sadd.s32 4294967295, %s2129_s18   ;;  %s1886_s20 = sadd.s32 4294967294, %s2129_s18   ;;  %s2129_s18 = sphi %s2167_s18, %s3508_s18   ;;  %s2125_s17 = sphi %s2165_s17, %s3507_s17   ;;  %s2121_s16 = sphi %s2163_s16, %s3506_s16   ;;  %s2117_s15 = sphi %s2161_s15, %s3505_s15  }
   0x7   : > { %p41_p0 = scmp.ne.s32.totalorder %s2121_s16, %s2117_s15  ;;  %p42_p1 = scmp.eq.s32.totalorder %s2182_s19, 0 }
   0x8   : > { %p128_p2 = scmp.eq.s32.totalorder %s2182_s19, 1  ;;  %p134_p3 = scmp.eq.s32.totalorder %s1886_s20, 1 }
   0x9   : > { %p2191_p4 = por %p42_p1, %p41_p0  ;;  %p1887_p5 = scmp.ge.s32.totalorder %s2129_s18, 1 }
   0xa   : > { %p2196_p6 = por %p134_p3, %p41_p0  ;;  %p141_p7 = scmp.lt.s32.totalorder %s2129_s18, 3 }
   0xb   : > { %s152_s25 = sshll.u32 %s3333_s1, 4  ;;  %s2131_s27 = smov [#allocation5]   ;;  %s153_s25 = int_to_ptr.hbm [resolvable:$true] %s152_s25 }
   0xc   : > { %p2204_p8 = pnand %p1887_p5, %p141_p7  ;;  %s154_s28 = sshll.u32 %s2131_s27, 4  ;;  %s155_s28 = int_to_ptr.vmem [resolvable:$true] %s154_s28 }
   0xd   : > { %s2214_s29 = sadd.s32 1, %s2129_s18   ;;  %s2132_s30 = smov 128  }
   0xe   : > { %p1944_p9 = pneg %p2204_p8  ;;  %s2133_s5 = smov 8  }
   0xf   : > { %s25_s6 = ssub.s32 %s2129_s18, %s2214_s29  ;;  %s28_s7 = sadd.s32 1, %s2125_s17 }
  0x10   : > { %p1945_p10 = pnand %p1944_p9, %p42_p1  ;;  %p26_p12 = scmp.eq.s32.totalorder %s25_s6, 0 }
  0x11   : > { %p35_p13 = scmp.ne.s32.totalorder %s2125_s17, %s2121_s16  ;;  %p36_p0 = scmp.eq.s32.totalorder %s2129_s18, 0 }
  0x12   : > { %1947 = dma.hbm_to_vmem [thread:$0]  (!%p1945_p10), %s153_s25, 2048, %s155_s28, [#allocation6], %s2132_s30, %s2132_s30, %s2133_s5  }
  0x13   : > { %s2226_s8 = scalar_select %p26_p12, %s2125_s17, %s28_s7  }
  0x14   : > { %p2230_p3 = por %p128_p2, %p35_p13  ;;  %p1957_p5 = scmp.lt.s32.totalorder %s2129_s18, 2 }
  0x15   : > { %s174_s10 = sand.u32 1, %s2125_s17   ;;  %s1902_s11 = sshll.u32 %s2129_s18, 8 }
  0x16   : > { %p37_p7 = por %p36_p0, %p35_p13  ;;  %s1890_s12 = sshll.u32 %s174_s10, 8 }
  0x17   : > { %s183_s20 = scalar_lea.hbm %s3332_s0, %s1902_s11  ;;  %s178_s24 = scalar_lea.vmem [#allocation2], %s1890_s12 }
  0x18   : > { %s184_s23 = sshll.u32 %s183_s20, 4  ;;  %s186_s25 = sshll.u32 %s178_s24, 4  ;;  %s185_s23 = int_to_ptr.hbm [resolvable:$true] %s184_s23  ;;  %s187_s25 = int_to_ptr.vmem [resolvable:$true] %s186_s25 }
  0x19   : > { %p2240_p9 = pnand %p1957_p5, %p37_p7  ;;  %s175_s28 = scalar_lea.sflag [#allocation3], %s174_s10 }
  0x1a   : > { %s2029_s6 = sshra.s32 %s185_s23, 4  ;;  %s2036_s12 = scalar_lea.hbm %s3332_s0, 512  ;;  %s2030_s6 = int_to_ptr.hbm [resolvable:$true] %s2029_s6 }
  0x1b   : > { %s2031_s7 = scalar_lea.hbm %s2030_s6, 256  ;;  %p2033_p10 = pneg %p2240_p9 }
  0x1c   : > { %p2032_p2 = scmp.ne.s32.totalorder %s2030_s6, %s2031_s7  ;;  %p2037_p0 = scmp.lt.s32.totalorder %s2030_s6, %s3332_s0 }
  0x1d   : > { %p2038_p5 = scmp.lt.s32.totalorder %s2036_s12, %s2031_s7 }
  0x1e   : > { %p2034_p12 = pnand %p2033_p10, %p2032_p2 }
  0x1f   : > { %p2039_p7 = por %p2038_p5, %p2037_p0 }
  0x20   : > { %p2035_p13 = pneg %p2034_p12 }
  0x22   : > { %p2040_p11 = pnand %p2039_p7, %p2035_p13 }
  0x24   : > { %2043 = shalt.err (!%p2040_p11)
}
  0x25   : > { %1951 = dma.hbm_to_vmem [thread:$0]  (!%p2240_p9), %s185_s23, 4096, %s187_s25, %s175_s28, %s2132_s30, %s2132_s30, %s2133_s5  }
  0x26   : > { %198 = sbr.rel (%p2204_p8) target bundleno = 616 (0x268), region = 36 }
  0x2b   : > { %s2260_s10 = sand.u32 1, %s2121_s16  }
  0x2c   : > { %s1894_s24 = sshll.u32 %s2260_s10, 8  ;;  %s201_s6 = scalar_lea.sflag [#allocation3], %s2260_s10 }
  0x2d   : > { %s2266_s7 = scalar_lea.vmem [#allocation2], %s1894_s24 }
  0x2e   : > { %2104 = dma.done.wait (%p2191_p4), %s201_s6, 4096  }
  0x2f   : > { %2106 = vsyncadd (%p2191_p4), %s201_s6, 4294963200 }
  0x30   : > { %2108 = dma.done.wait (%p42_p1), [#allocation6], 2048  }
  0x31   : > { %2110 = vsyncadd (%p42_p1), [#allocation6], 4294965248  ;;  %v284_v0 = vld [vmem:[#allocation5 + $0x78] sm:$0xff]  ;;  %v283_v1 = vld [vmem:[#allocation5 + $0x70] sm:$0xff]  ;;  %s3095_s23 = scalar_lea.vmem [#allocation7], %s1894_s24  ;;  %s1903_s25 = sshll.u32 %s2182_s19, 8 }
  0x32   : > { %v282_v2 = vld [vmem:[#allocation5 + $0x68] sm:$0xff]  ;;  %v2276_v3 = vand.u32 4294901760, %v284_v0  ;;  %v2278_v4 = vand.u32 4294901760, %v283_v1  ;;  %v281_v6 = vld [vmem:[#allocation5 + $0x60] sm:$0xff]  ;;  %v280_v7 = vld [vmem:[#allocation5 + $0x58] sm:$0xff]  ;;  %s1799_s11 = scalar_lea.hbm %s3336_s4, %s1903_s25  ;;  %s1800_s13 = sshll.u32 %s3095_s23, 4  ;;  %s1801_s13 = int_to_ptr.vmem [resolvable:$true] %s1800_s13 }
  0x33   : > { %v2280_v5 = vand.u32 4294901760, %v282_v2  ;;  %v279_v8 = vld [vmem:[#allocation5 + $0x50] sm:$0xff]  ;;  %v2282_v9 = vand.u32 4294901760, %v281_v6  ;;  %v2284_v10 = vand.u32 4294901760, %v280_v7  ;;  %v278_v12 = vld [vmem:[#allocation5 + $0x48] sm:$0xff]  ;;  %v277_v13 = vld [vmem:[#allocation5 + $0x40] sm:$0xff] }
  0x34   : > { %v2286_v11 = vand.u32 4294901760, %v279_v8  ;;  %1904 = vmatpush.msra.mxu2 %v2276_v3  ;;  %v2290_v14 = vsub.f32 %v284_v0, %v2276_v3  ;;  %v2293_v15 = vsub.f32 %v283_v1, %v2278_v4  ;;  %286 = vmatpush.msra.mxu0 %v2276_v3  ;;  %v276_v17 = vld [vmem:[#allocation5 + $0x38] sm:$0xff]  ;;  %v2299_v18 = vand.u32 4294901760, %v278_v12  ;;  %v275_v25 = vld [vmem:[#allocation5 + $0x30] sm:$0xff]  ;;  %v274_v33 = vld [vmem:[#allocation5 + $0x28] sm:$0xff]  ;;  %s1802_s12 = sshll.u32 %s1799_s11, 4  ;;  %s1803_s12 = int_to_ptr.hbm [resolvable:$true] %s1802_s12 }
  0x35   : > { %v2296_v16 = vsub.f32 %v282_v2, %v2280_v5  ;;  %v2302_v19 = vsub.f32 %v281_v6, %v2282_v9  ;;  %v2305_v20 = vsub.f32 %v280_v7, %v2284_v10  ;;  %v2311_v24 = vand.u32 4294901760, %v277_v13  ;;  %v273_v42 = vld [vmem:[#allocation5 + $0x20] sm:$0xff]  ;;  %v272_v49 = vld [vmem:[#allocation5 + $0x18] sm:$0xff]  ;;  %v271_v55 = vld [vmem:[#allocation5 + $0x10] sm:$0xff]  ;;  %s1788_s19 = scalar_lea.sflag [#allocation4], %s2260_s10  ;;  %s2073_s14 = sshra.s32 %s1803_s12, 4  ;;  %s2074_s14 = int_to_ptr.hbm [resolvable:$true] %s2073_s14 }
  0x36   : > { %1905 = vmatpush.msra.mxu2 %v2278_v4  ;;  %v576_v21 = vand.u32 4294901760, %v2290_v14  ;;  %v582_v22 = vand.u32 4294901760, %v2293_v15  ;;  %288 = vmatpush.msra.mxu0 %v2278_v4  ;;  %v2315_v27 = vand.u32 4294901760, %v276_v17  ;;  %v2318_v28 = vsub.f32 %v279_v8, %v2286_v11  ;;  %v253_v47 = vld [vmem:[%s2266_s7 + $0x80] sm:$0xff]  ;;  %v270_v62 = vld [vmem:[#allocation5 + $0x8] sm:$0xff]  ;;  %s2075_s20 = scalar_lea.hbm %s2074_s14, 256  ;;  %p2080_p11 = scmp.lt.s32.totalorder %s2074_s14, %s3336_s4 }
  0x37   : > { %v588_v23 = vand.u32 4294901760, %v2296_v16  ;;  %v594_v26 = vand.u32 4294901760, %v2302_v19  ;;  %v600_v32 = vand.u32 4294901760, %v2305_v20  ;;  %v2335_v35 = vand.u32 4294901760, %v275_v25  ;;  %v269_v2 = vld [vmem:[#allocation5] sm:$0xff]  ;;  %p2076_p1 = scmp.ne.s32.totalorder %s2074_s14, %s2075_s20 }
  0x38   : > { %1906 = vmatpush.msra.mxu2 %v2280_v5  ;;  %v577_v29 = vsub.f32 %v2290_v14, %v576_v21  ;;  %v583_v30 = vsub.f32 %v2293_v15, %v582_v22  ;;  %290 = vmatpush.msra.mxu0 %v2280_v5  ;;  %v2338_v36 = vsub.f32 %v278_v12, %v2299_v18  ;;  %v3348_v39 = vand.u32 4294901760, %v2318_v28  ;;  %v237_v12 = vld [vmem:[%s2266_s7] sm:$0xff] }
  0x39   : > { %v589_v31 = vsub.f32 %v2296_v16, %v588_v23  ;;  %v595_v34 = vsub.f32 %v2302_v19, %v594_v26  ;;  %v2344_v40 = vsub.f32 %v277_v13, %v2311_v24  ;;  %v2346_v41 = vand.u32 4294901760, %v274_v33  ;;  %p2077_p4 = pnand %p2076_p1, %p2230_p3 }
  0x3a   : > { %1907 = vmatpush.msra.mxu2 %v2282_v9  ;;  %v578_v37 = vand.u32 4294901760, %v577_v29  ;;  %v584_v38 = vand.u32 4294901760, %v583_v30  ;;  %292 = vmatpush.msra.mxu0 %v2282_v9  ;;  %v601_v44 = vsub.f32 %v2305_v20, %v600_v32  ;;  %v3347_v45 = vand.u32 4294901760, %v2338_v36  ;;  %v254_v30 = vld [vmem:[%s2266_s7 + $0x88] sm:$0xff] }
  0x3b   : > { %v590_v43 = vand.u32 4294901760, %v589_v31  ;;  %v2354_v46 = vsub.f32 %v276_v17, %v2315_v27  ;;  %v3345_v48 = vand.u32 4294901760, %v2344_v40  ;;  %v596_v50 = vand.u32 4294901760, %v595_v34  ;;  %p2078_p8 = pneg %p2077_p4 }
  0x3c   : > { %1908 = vmatpush.msra.mxu2 %v2284_v10  ;;  %1920 = vmatpush.msra.mxu3 %v578_v37  ;;  %v607_v51 = vsub.f32 %v2318_v28, %v3348_v39  ;;  %v2363_v52 = vand.u32 4294901760, %v273_v42  ;;  %v2366_v53 = vsub.f32 %v275_v25, %v2335_v35  ;;  %v2370_v56 = vand.u32 4294901760, %v253_v47 }
  0x3d   : > { %579 = vmatpush.msra.mxu1 %v578_v37  ;;  %294 = vmatpush.msra.mxu0 %v2284_v10  ;;  %v3341_v54 = vand.u32 4294901760, %v2354_v46  ;;  %v602_v57 = vand.u32 4294901760, %v601_v44  ;;  %v613_v58 = vsub.f32 %v2338_v36, %v3347_v45  ;;  %v2376_v59 = vand.u32 4294901760, %v272_v49  ;;  %v256_v45 = vld [vmem:[%s2266_s7 + $0x98] sm:$0xff] }
  0x3e   : > { %1909 = vmatpush.msra.mxu2 %v2286_v11  ;;  %1921 = vmatpush.msra.mxu3 %v584_v38  ;;  %v2379_v60 = vsub.f32 %v274_v33, %v2346_v41  ;;  %v619_v61 = vsub.f32 %v2344_v40, %v3345_v48  ;;  %v608_v63 = vand.u32 4294901760, %v607_v51  ;;  %v2386_v0 = vand.u32 4294901760, %v271_v55 }
  0x3f   : > { %585 = vmatpush.msra.mxu1 %v584_v38  ;;  %296 = vmatpush.msra.mxu0 %v2286_v11  ;;  %v3340_v1 = vand.u32 4294901760, %v2366_v53  ;;  %v2390_v6 = vsub.f32 %v273_v42, %v2363_v52  ;;  %v625_v7 = vsub.f32 %v2354_v46, %v3341_v54  ;;  %v2397_v8 = vsub.f32 %v253_v47, %v2370_v56 }
  0x40   : > { %1910 = vmatpush.msra.mxu2 %v2299_v18  ;;  %1922 = vmatpush.msra.mxu3 %v590_v43  ;;  %v614_v13 = vand.u32 4294901760, %v613_v58  ;;  %v2401_v17 = vand.u32 4294901760, %v270_v62  ;;  %v3337_v25 = vand.u32 4294901760, %v2379_v60  ;;  %v2405_v29 = vsub.f32 %v272_v49, %v2376_v59 }
  0x41   : > { %591 = vmatpush.msra.mxu1 %v590_v43  ;;  %298 = vmatpush.msra.mxu0 %v2299_v18  ;;  %v620_v31 = vand.u32 4294901760, %v619_v61  ;;  %v2408_v33 = vand.u32 4294901760, %v269_v2  ;;  %v631_v34 = vsub.f32 %v2366_v53, %v3340_v1  ;;  %v3339_v37 = vand.u32 4294901760, %v2390_v6 }
  0x42   : > { %1911 = vmatpush.msra.mxu2 %v2311_v24  ;;  %1923 = vmatpush.msra.mxu3 %v596_v50  ;;  %v2417_v38 = vsub.f32 %v271_v55, %v2386_v0  ;;  %v2419_v42 = vand.u32 4294901760, %v237_v12  ;;  %v626_v43 = vand.u32 4294901760, %v625_v7  ;;  %v3338_v44 = vand.u32 4294901760, %v2397_v8 }
  0x43   : > { %597 = vmatpush.msra.mxu1 %v596_v50  ;;  %300 = vmatpush.msra.mxu0 %v2311_v24  ;;  %v2423_v47 = vand.u32 4294901760, %v254_v30  ;;  %v637_v49 = vsub.f32 %v2379_v60, %v3337_v25  ;;  %v3342_v50 = vand.u32 4294901760, %v2405_v29  ;;  %v2431_v51 = vsub.f32 %v270_v62, %v2401_v17 }
  0x44   : > { %1912 = vmatpush.msra.mxu2 %v2315_v27  ;;  %1924 = vmatpush.msra.mxu3 %v602_v57  ;;  %v2434_v55 = vsub.f32 %v237_v12, %v2419_v42  ;;  %v632_v58 = vand.u32 4294901760, %v631_v34  ;;  %v643_v61 = vsub.f32 %v2390_v6, %v3339_v37  ;;  %v2444_v62 = vsub.f32 %v269_v2, %v2408_v33  ;;  %v255_v34 = vld [vmem:[%s2266_s7 + $0x90] sm:$0xff] }
  0x45   : > { %603 = vmatpush.msra.mxu1 %v602_v57  ;;  %302 = vmatpush.msra.mxu0 %v2315_v27  ;;  %v238_v57 = vld [vmem:[%s2266_s7 + $0x8] sm:$0xff]  ;;  %v448_v7 = vsub.f32 %v2397_v8, %v3338_v44  ;;  %v2451_v12 = vsub.f32 %v254_v30, %v2423_v47  ;;  %v638_v2 = vand.u32 4294901760, %v637_v49  ;;  %v3346_v44 = vand.u32 4294901760, %v2431_v51 }
  0x46   : > { %1913 = vmatpush.msra.mxu2 %v2335_v35  ;;  %1925 = vmatpush.msra.mxu3 %v608_v63  ;;  %v2455_v25 = vand.u32 4294901760, %v238_v57  ;;  %v644_v30 = vand.u32 4294901760, %v643_v61  ;;  %v666_v49 = vand.u32 4294901760, %v2444_v62  ;;  %v2468_v1 = vand.u32 4294901760, %v255_v34 }
  0x47   : > { %609 = vmatpush.msra.mxu1 %v608_v63  ;;  %304 = vmatpush.msra.mxu0 %v2335_v35  ;;  %v3343_v63 = vand.u32 4294901760, %v2417_v38  ;;  %v449_v54 = vand.u32 4294901760, %v448_v7  ;;  %v239_v7 = vld [vmem:[%s2266_s7 + $0x10] sm:$0xff] }
  0x48   : > { %1914 = vmatpush.msra.mxu2 %v2346_v41  ;;  %1926 = vmatpush.msra.mxu3 %v614_v13  ;;  %v2476_v61 = vsub.f32 %v238_v57, %v2455_v25  ;;  %v667_v57 = vsub.f32 %v2444_v62, %v666_v49  ;;  %v2489_v48 = vsub.f32 %v255_v34, %v2468_v1  ;;  %v2496_v39 = vand.u32 4294901760, %v239_v7 }
  0x49   : > { %615 = vmatpush.msra.mxu1 %v614_v13  ;;  %306 = vmatpush.msra.mxu0 %v2346_v41  ;;  %v3344_v13 = vand.u32 4294901760, %v2434_v55  ;;  %v655_v37 = vsub.f32 %v2417_v38, %v3343_v63  ;;  %v2501_v34 = vand.u32 4294901760, %v256_v45 }
  0x4a   : > { %1915 = vmatpush.msra.mxu2 %v2363_v52  ;;  %1927 = vmatpush.msra.mxu3 %v620_v31 }
  0x4b   : > { %621 = vmatpush.msra.mxu1 %v620_v31  ;;  %308 = vmatpush.msra.mxu0 %v2363_v52  ;;  %v649_v31 = vsub.f32 %v2405_v29, %v3342_v50  ;;  %v3357_v50 = vand.u32 4294901760, %v2451_v12 }
  0x4c   : > { %1916 = vmatpush.msra.mxu2 %v2376_v59  ;;  %1928 = vmatpush.msra.mxu3 %v626_v43 }
  0x4d   : > { %627 = vmatpush.msra.mxu1 %v626_v43  ;;  %310 = vmatpush.msra.mxu0 %v2376_v59  ;;  %v320_v43 = vsub.f32 %v2434_v55, %v3344_v13  ;;  %v650_v63 = vand.u32 4294901760, %v649_v31  ;;  %v656_v13 = vand.u32 4294901760, %v655_v37  ;;  %v456_v31 = vsub.f32 %v2451_v12, %v3357_v50 }
  0x4e   : > { %1917 = vmatpush.msra.mxu2 %v2386_v0  ;;  %1929 = vmatpush.msra.mxu3 %v632_v58 }
  0x4f   : > { %633 = vmatpush.msra.mxu1 %v632_v58  ;;  %312 = vmatpush.msra.mxu0 %v2386_v0  ;;  %v661_v58 = vsub.f32 %v2431_v51, %v3346_v44  ;;  %v3370_v44 = vand.u32 4294901760, %v2476_v61 }
  0x50   : > { %1918 = vmatpush.msra.mxu2 %v2401_v17  ;;  %1930 = vmatpush.msra.mxu3 %v638_v2 }
  0x51   : > { %639 = vmatpush.msra.mxu1 %v638_v2  ;;  %314 = vmatpush.msra.mxu0 %v2401_v17  ;;  %v321_v2 = vand.u32 4294901760, %v320_v43  ;;  %v662_v37 = vand.u32 4294901760, %v661_v58  ;;  %v3356_v43 = vand.u32 4294901760, %v2489_v48  ;;  %v328_v58 = vsub.f32 %v2476_v61, %v3370_v44  ;;  %v267_v44 = vld [vmem:[%s2266_s7 + $0xf0] sm:$0xff] }
  0x52   : > { %1919 = vmatpush.msra.mxu2 %v2408_v33  ;;  %1931 = vmatpush.msra.mxu3 %v644_v30 }
  0x53   : > { %450 = vmatmul.f32.vlgmr.msra.gmra.mxu2 %v449_v54  ;;  %645 = vmatpush.msra.mxu1 %v644_v30  ;;  %v668_v54 = vand.u32 4294901760, %v667_v57  ;;  %v457_v30 = vand.u32 4294901760, %v456_v31  ;;  %v240_v57 = vld [vmem:[%s2266_s7 + $0x18] sm:$0xff]  ;;  %v257_v31 = vld [vmem:[%s2266_s7 + $0xa0] sm:$0xff] }
  0x54   : > { %1932 = vmatpush.msra.mxu3 %v650_v63  ;;  %801 = vmatpush.msrb.mxu2 %v2290_v14  ;;  %v329_v14 = vand.u32 4294901760, %v328_v58 }
  0x55   : > { %651 = vmatpush.msra.mxu1 %v650_v63  ;;  %316 = vmatpush.msra.mxu0 %v2408_v33  ;;  %v2508_v63 = vsub.f32 %v239_v7, %v2496_v39  ;;  %v464_v7 = vsub.f32 %v2489_v48, %v3356_v43 }
  0x56   : > { %1933 = vmatpush.msra.mxu3 %v656_v13  ;;  %804 = vmatpush.msrb.mxu2 %v2293_v15  ;;  %v2532_v15 = vand.u32 4294901760, %v257_v31 }
  0x57   : > { %657 = vmatpush.msra.mxu1 %v656_v13  ;;  %322 = vmatmul.f32.vlgmr.msra.gmra.mxu0 %v321_v2  ;;  %v2515_v13 = vsub.f32 %v256_v45, %v2501_v34  ;;  %v2525_v2 = vand.u32 4294901760, %v240_v57 }
  0x58   : > { %1934 = vmatpush.msra.mxu3 %v662_v37  ;;  %1236 = vmatpush.msrb.mxu0 %v576_v21  ;;  %v3368_v21 = vand.u32 4294901760, %v2508_v63 }
  0x59   : > { %663 = vmatpush.msra.mxu1 %v662_v37  ;;  %807 = vmatpush.msrb.mxu2 %v2296_v16  ;;  %v3354_v45 = vand.u32 4294901760, %v2515_v13 }
  0x5a   : > { %1935 = vmatpush.msra.mxu3 %v668_v54  ;;  %1240 = vmatpush.msrb.mxu0 %v582_v22  ;;  %v465_v22 = vand.u32 4294901760, %v464_v7  ;;  %v336_v37 = vsub.f32 %v2508_v63, %v3368_v21 }
  0x5b   : > { %458 = vmatmul.f32.gmra.mxu2 %v457_v30  ;;  %735 = vmatmul.f32.vlgmr.msra.gmra.mxu3 %v2370_v56  ;;  %v2549_v30 = vsub.f32 %v257_v31, %v2532_v15 }
  0x5c   : > { %1009 = vmatpush.msrb.mxu3 %v2276_v3  ;;  %669 = vmatpush.msra.mxu1 %v668_v54  ;;  %v2540_v54 = vsub.f32 %v240_v57, %v2525_v2  ;;  %v337_v58 = vand.u32 4294901760, %v336_v37  ;;  %v258_v57 = vld [vmem:[%s2266_s7 + $0xa8] sm:$0xff]  ;;  %v259_v37 = vld [vmem:[%s2266_s7 + $0xb0] sm:$0xff] }
  0x5d   : > { %671 = vmatmul.f32.vlgmr.msra.gmra.mxu1 %v2419_v42  ;;  %810 = vmatpush.msrb.mxu2 %v2302_v19  ;;  %v2572_v31 = vand.u32 4294901760, %v258_v57 }
  0x5e   : > { %1011 = vmatpush.msrb.mxu3 %v2278_v4  ;;  %1427 = vmatpush.msrb.mxu1 %v2276_v3  ;;  %v241_v3 = vld [vmem:[%s2266_s7 + $0x20] sm:$0xff]  ;;  %v3366_v16 = vand.u32 4294901760, %v2540_v54 }
  0x5f   : > { %330 = vmatmul.f32.gmra.mxu0 %v329_v14  ;;  %813 = vmatpush.msrb.mxu2 %v2305_v20 }
  0x60   : > { %1013 = vmatpush.msrb.mxu3 %v2280_v5  ;;  %1429 = vmatpush.msrb.mxu1 %v2278_v4  ;;  %v472_v4 = vsub.f32 %v2515_v13, %v3354_v45  ;;  %v344_v14 = vsub.f32 %v2540_v54, %v3366_v16 }
  0x61   : > { %1244 = vmatpush.msrb.mxu0 %v588_v23  ;;  %816 = vmatpush.msrb.mxu2 %v2318_v28  ;;  %v2558_v23 = vand.u32 4294901760, %v241_v3 }
  0x62   : > { %1015 = vmatpush.msrb.mxu3 %v2282_v9  ;;  %1431 = vmatpush.msrb.mxu1 %v2280_v5  ;;  %v3353_v5 = vand.u32 4294901760, %v2549_v30  ;;  %v473_v7 = vand.u32 4294901760, %v472_v4  ;;  %v345_v20 = vand.u32 4294901760, %v344_v14  ;;  %v3408_v14 = vand.u32 4294901760, %v2344_v40 }
  0x63   : > { %466 = vmatmul.f32.gmra.mxu2 %v465_v22  ;;  %739 = vmatmul.f32.gmra.mxu3 %v2423_v47  ;;  %v2575_v19 = vsub.f32 %v241_v3, %v2558_v23  ;;  %v3406_v22 = vand.u32 4294901760, %v2318_v28  ;;  %v3407_v28 = vand.u32 4294901760, %v2338_v36 }
  0x64   : > { %1017 = vmatpush.msrb.mxu3 %v2284_v10  ;;  %1248 = vmatpush.msrb.mxu0 %v594_v26  ;;  %v480_v26 = vsub.f32 %v2549_v30, %v3353_v5 }
  0x65   : > { %675 = vmatmul.f32.gmra.mxu1 %v2455_v25  ;;  %819 = vmatpush.msrb.mxu2 %v2338_v36 }
  0x66   : > { %1433 = vmatpush.msrb.mxu1 %v2282_v9  ;;  %1019 = vmatpush.msrb.mxu3 %v2286_v11  ;;  %v242_v9 = vld [vmem:[%s2266_s7 + $0x28] sm:$0xff]  ;;  %v481_v4 = vand.u32 4294901760, %v480_v26  ;;  %v3409_v26 = vand.u32 4294901760, %v2354_v46 }
  0x67   : > { %338 = vmatmul.f32.gmra.mxu0 %v337_v58  ;;  %822 = vmatpush.msrb.mxu2 %v2344_v40  ;;  %v2596_v3 = vand.u32 4294901760, %v242_v9 }
  0x68   : > { %1252 = vmatpush.msrb.mxu0 %v600_v32  ;;  %1435 = vmatpush.msrb.mxu1 %v2284_v10  ;;  %v2592_v10 = vsub.f32 %v258_v57, %v2572_v31  ;;  %v3364_v32 = vand.u32 4294901760, %v2575_v19 }
  0x69   : > { %1021 = vmatpush.msrb.mxu3 %v2299_v18  ;;  %825 = vmatpush.msrb.mxu2 %v2354_v46  ;;  %v2612_v36 = vsub.f32 %v242_v9, %v2596_v3  ;;  %v3410_v46 = vand.u32 4294901760, %v2366_v53 }
  0x6a   : > { %1256 = vmatpush.msrb.mxu0 %v3406_v22  ;;  %1437 = vmatpush.msrb.mxu1 %v2286_v11  ;;  %v2603_v11 = vand.u32 4294901760, %v259_v37  ;;  %v3352_v58 = vand.u32 4294901760, %v2592_v10  ;;  %v352_v57 = vsub.f32 %v2575_v19, %v3364_v32 }
  0x6b   : > { %474 = vmatmul.f32.gmra.mxu2 %v473_v7  ;;  %743 = vmatmul.f32.gmra.mxu3 %v2468_v1  ;;  %v243_v7 = vld [vmem:[%s2266_s7 + $0x30] sm:$0xff]  ;;  %v3363_v9 = vand.u32 4294901760, %v2612_v36 }
  0x6c   : > { %1023 = vmatpush.msrb.mxu3 %v2311_v24  ;;  %1260 = vmatpush.msrb.mxu0 %v3407_v28  ;;  %v488_v40 = vsub.f32 %v2592_v10, %v3352_v58  ;;  %v2632_v22 = vand.u32 4294901760, %v243_v7 }
  0x6d   : > { %679 = vmatmul.f32.gmra.mxu1 %v2496_v39  ;;  %828 = vmatpush.msrb.mxu2 %v2366_v53  ;;  %v360_v28 = vsub.f32 %v2612_v36, %v3363_v9 }
  0x6e   : > { %1439 = vmatpush.msrb.mxu1 %v2299_v18  ;;  %1025 = vmatpush.msrb.mxu3 %v2315_v27  ;;  %v2622_v18 = vsub.f32 %v259_v37, %v2603_v11  ;;  %v489_v37 = vand.u32 4294901760, %v488_v40  ;;  %v2649_v53 = vsub.f32 %v243_v7, %v2632_v22  ;;  %v261_v40 = vld [vmem:[%s2266_s7 + $0xc0] sm:$0xff] }
  0x6f   : > { %346 = vmatmul.f32.gmra.mxu0 %v345_v20  ;;  %831 = vmatpush.msrb.mxu2 %v2379_v60  ;;  %v260_v20 = vld [vmem:[%s2266_s7 + $0xb8] sm:$0xff] }
  0x70   : > { %1264 = vmatpush.msrb.mxu0 %v3408_v14  ;;  %1441 = vmatpush.msrb.mxu1 %v2311_v24  ;;  %v353_v24 = vand.u32 4294901760, %v352_v57  ;;  %v244_v57 = vld [vmem:[%s2266_s7 + $0x38] sm:$0xff]  ;;  %v3411_v14 = vand.u32 4294901760, %v2379_v60  ;;  %v361_v60 = vand.u32 4294901760, %v360_v28  ;;  %v245_v28 = vld [vmem:[%s2266_s7 + $0x40] sm:$0xff] }
  0x71   : > { %1027 = vmatpush.msrb.mxu3 %v2335_v35  ;;  %834 = vmatpush.msrb.mxu2 %v2390_v6 }
  0x72   : > { %1268 = vmatpush.msrb.mxu0 %v3409_v26  ;;  %1443 = vmatpush.msrb.mxu1 %v2315_v27  ;;  %v3351_v27 = vand.u32 4294901760, %v2622_v18  ;;  %v3412_v26 = vand.u32 4294901760, %v2390_v6  ;;  %v3413_v6 = vand.u32 4294901760, %v2405_v29 }
  0x73   : > { %482 = vmatmul.f32.gmra.mxu2 %v481_v4  ;;  %747 = vmatmul.f32.gmra.mxu3 %v2501_v34  ;;  %v2646_v4 = vand.u32 4294901760, %v260_v20 }
  0x74   : > { %1029 = vmatpush.msrb.mxu3 %v2346_v41  ;;  %1272 = vmatpush.msrb.mxu0 %v3410_v46 }
  0x75   : > { %683 = vmatmul.f32.gmra.mxu1 %v2525_v2  ;;  %837 = vmatpush.msrb.mxu2 %v2405_v29  ;;  %v2666_v7 = vsub.f32 %v260_v20, %v2646_v4 }
  0x76   : > { %1445 = vmatpush.msrb.mxu1 %v2335_v35  ;;  %1031 = vmatpush.msrb.mxu3 %v2363_v52  ;;  %v496_v35 = vsub.f32 %v2622_v18, %v3351_v27 }
  0x77   : > { %354 = vmatmul.f32.gmra.mxu0 %v353_v24  ;;  %840 = vmatpush.msrb.mxu2 %v2417_v38  ;;  %v2670_v24 = vand.u32 4294901760, %v244_v57  ;;  %v3350_v46 = vand.u32 4294901760, %v2666_v7 }
  0x78   : > { %1276 = vmatpush.msrb.mxu0 %v3411_v14  ;;  %1447 = vmatpush.msrb.mxu1 %v2346_v41  ;;  %v3362_v41 = vand.u32 4294901760, %v2649_v53  ;;  %v497_v20 = vand.u32 4294901760, %v496_v35  ;;  %v3415_v14 = vand.u32 4294901760, %v2417_v38  ;;  %v3416_v35 = vand.u32 4294901760, %v2431_v51 }
  0x79   : > { %1033 = vmatpush.msrb.mxu3 %v2376_v59  ;;  %843 = vmatpush.msrb.mxu2 %v2431_v51  ;;  %v504_v38 = vsub.f32 %v2666_v7, %v3350_v46 }
  0x7a   : > { %1280 = vmatpush.msrb.mxu0 %v3412_v26  ;;  %1449 = vmatpush.msrb.mxu1 %v2363_v52  ;;  %v2677_v52 = vand.u32 4294901760, %v261_v40  ;;  %v368_v29 = vsub.f32 %v2649_v53, %v3362_v41  ;;  %v2704_v26 = vand.u32 4294901760, %v245_v28 }
  0x7b   : > { %490 = vmatmul.f32.gmra.mxu2 %v489_v37  ;;  %751 = vmatmul.f32.gmra.mxu3 %v2532_v15  ;;  %v2686_v37 = vsub.f32 %v244_v57, %v2670_v24  ;;  %v505_v51 = vand.u32 4294901760, %v504_v38 }
  0x7c   : > { %1035 = vmatpush.msrb.mxu3 %v2386_v0  ;;  %1284 = vmatpush.msrb.mxu0 %v3413_v6  ;;  %3414 = vst [vmem:[#allocation11_spill] sm:$0xff] %v2677_v52  ;;  %v369_v57 = vand.u32 4294901760, %v368_v29 }
  0x7d   : > { %687 = vmatmul.f32.gmra.mxu1 %v2558_v23  ;;  %846 = vmatpush.msrb.mxu2 %v2444_v62  ;;  %v246_v62 = vld [vmem:[%s2266_s7 + $0x48] sm:$0xff] }
  0x7e   : > { %1451 = vmatpush.msrb.mxu1 %v2376_v59  ;;  %1037 = vmatpush.msrb.mxu3 %v2401_v17  ;;  %v2694_v59 = vsub.f32 %v261_v40, %v2677_v52  ;;  %v2730_v38 = vand.u32 4294901760, %v246_v62 }
  0x7f   : > { %362 = vmatmul.f32.gmra.mxu0 %v361_v60  ;;  %v262_v60 = vld [vmem:[%s2266_s7 + $0xc8] sm:$0xff] }
  0x80   : > { %1288 = vmatpush.msrb.mxu0 %v3415_v14  ;;  %1453 = vmatpush.msrb.mxu1 %v2386_v0  ;;  %v3360_v0 = vand.u32 4294901760, %v2686_v37  ;;  %v2715_v6 = vand.u32 4294901760, %v262_v60 }
  0x81   : > { %1039 = vmatpush.msrb.mxu3 %v2408_v33 }
  0x82   : > { %1292 = vmatpush.msrb.mxu0 %v3416_v35  ;;  %1455 = vmatpush.msrb.mxu1 %v2401_v17  ;;  %v3349_v17 = vand.u32 4294901760, %v2694_v59  ;;  %v376_v40 = vsub.f32 %v2686_v37, %v3360_v0  ;;  %3417 = vst [vmem:[#allocation12_spill] sm:$0xff] %v2715_v6  ;;  %v2726_v29 = vsub.f32 %v262_v60, %v2715_v6  ;;  %v263_v35 = vld [vmem:[%s2266_s7 + $0xd0] sm:$0xff] }
  0x83   : > { %498 = vmatmul.f32.gmra.mxu2 %v497_v20  ;;  %755 = vmatmul.f32.gmra.mxu3 %v2572_v31  ;;  %v2718_v20 = vsub.f32 %v245_v28, %v2704_v26  ;;  %v2733_v28 = vand.u32 4294901760, %v263_v35  ;;  %v2740_v60 = vsub.f32 %v246_v62, %v2730_v38  ;;  %v264_v62 = vld [vmem:[%s2266_s7 + $0xd8] sm:$0xff] }
  0x84   : > { %1296 = vmatpush.msrb.mxu0 %v666_v49  ;;  %1457 = vmatpush.msrb.mxu1 %v2408_v33  ;;  %v512_v33 = vsub.f32 %v2694_v59, %v3349_v17  ;;  %v377_v49 = vand.u32 4294901760, %v376_v40  ;;  %3418 = vst [vmem:[#allocation13_spill] sm:$0xff] %v2726_v29  ;;  %v247_v17 = vld [vmem:[%s2266_s7 + $0x50] sm:$0xff]  ;;  %v2759_v45 = vand.u32 4294901760, %v264_v62 }
  0x85   : > { %691 = vmatmul.f32.gmra.mxu1 %v2596_v3  ;;  %v3359_v14 = vand.u32 4294901760, %v2718_v20  ;;  %3419 = vst [vmem:[#allocation14_spill] sm:$0xff] %v2733_v28  ;;  %v2744_v46 = vsub.f32 %v263_v35, %v2733_v28  ;;  %v3358_v27 = vand.u32 4294901760, %v2740_v60  ;;  %v2751_v58 = vand.u32 4294901760, %v247_v17 }
  0x86   : > { %3421 = vst [vmem:[#allocation16_spill] sm:$0xff] %v2759_v45 }
  0x87   : > { %370 = vmatmul.f32.gmra.mxu0 %v369_v57  ;;  %v513_v57 = vand.u32 4294901760, %v512_v33  ;;  %v384_v40 = vsub.f32 %v2718_v20, %v3359_v14  ;;  %3420 = vst [vmem:[#allocation15_spill] sm:$0xff] %v2744_v46  ;;  %v3361_v5 = vand.u32 4294901760, %v2744_v46 }
  0x89   : > { %v528_v43 = vsub.f32 %v2744_v46, %v3361_v5  ;;  %v249_v5 = vld [vmem:[%s2266_s7 + $0x60] sm:$0xff] }
  0x8a   : > { %v2795_v32 = vand.u32 4294901760, %v249_v5 }
  0x8b   : > { %506 = vmatmul.f32.gmra.mxu2 %v505_v51  ;;  %759 = vmatmul.f32.gmra.mxu3 %v2603_v11  ;;  %v3355_v51 = vand.u32 4294901760, %v2726_v29  ;;  %v529_v0 = vand.u32 4294901760, %v528_v43 }
  0x8d   : > { %695 = vmatmul.f32.gmra.mxu1 %v2632_v22  ;;  %v520_v33 = vsub.f32 %v2726_v29, %v3355_v51  ;;  %v248_v51 = vld [vmem:[%s2266_s7 + $0x58] sm:$0xff] }
  0x8e   : > { %v2774_v14 = vand.u32 4294901760, %v248_v51 }
  0x8f   : > { %378 = vmatmul.f32.gmra.mxu0 %v377_v49  ;;  %v385_v49 = vand.u32 4294901760, %v384_v40  ;;  %v521_v35 = vand.u32 4294901760, %v520_v33  ;;  %v2762_v40 = vsub.f32 %v247_v17, %v2751_v58 }
  0x91   : > { %v3365_v50 = vand.u32 4294901760, %v2762_v40 }
  0x93   : > { %514 = vmatmul.f32.gmra.mxu2 %v513_v57  ;;  %763 = vmatmul.f32.gmra.mxu3 %v2646_v4  ;;  %v392_v57 = vsub.f32 %v2740_v60, %v3358_v27  ;;  %v265_v27 = vld [vmem:[%s2266_s7 + $0xe0] sm:$0xff] }
  0x94   : > { %v2777_v17 = vand.u32 4294901760, %v265_v27 }
  0x95   : > { %699 = vmatmul.f32.gmra.mxu1 %v2670_v24  ;;  %v393_v33 = vand.u32 4294901760, %v392_v57  ;;  %v400_v57 = vsub.f32 %v2762_v40, %v3365_v50 }
  0x96   : > { %v2788_v41 = vsub.f32 %v265_v27, %v2777_v17 }
  0x97   : > { %386 = vmatmul.f32.gmra.mxu0 %v385_v49  ;;  %v2770_v49 = vsub.f32 %v264_v62, %v2759_v45  ;;  %v2784_v62 = vsub.f32 %v248_v51, %v2774_v14  ;;  %v266_v51 = vld [vmem:[%s2266_s7 + $0xe8] sm:$0xff] }
  0x98   : > { %3423 = vst [vmem:[#allocation18_spill] sm:$0xff] %v2788_v41  ;;  %v3375_v50 = vand.u32 4294901760, %v2788_v41  ;;  %v2803_v16 = vand.u32 4294901760, %v266_v51 }
  0x99   : > { %3422 = vst [vmem:[#allocation17_spill] sm:$0xff] %v2770_v49  ;;  %v3369_v9 = vand.u32 4294901760, %v2784_v62 }
  0x9a   : > { %v544_v21 = vsub.f32 %v2788_v41, %v3375_v50  ;;  %v251_v50 = vld [vmem:[%s2266_s7 + $0x70] sm:$0xff] }
  0x9b   : > { %522 = vmatmul.f32.gmra.mxu2 %v521_v35  ;;  %767 = vmatmul.f32.gmra.mxu3 %v2677_v52  ;;  %v3367_v35 = vand.u32 4294901760, %v2770_v49 }
  0x9c   : > { %v545_v46 = vand.u32 4294901760, %v544_v21 }
  0x9d   : > { %703 = vmatmul.f32.gmra.mxu1 %v2704_v26  ;;  %v536_v43 = vsub.f32 %v2770_v49, %v3367_v35  ;;  %v250_v35 = vld [vmem:[%s2266_s7 + $0x68] sm:$0xff] }
  0x9e   : > { %v2818_v49 = vand.u32 4294901760, %v250_v35 }
  0x9f   : > { %394 = vmatmul.f32.gmra.mxu0 %v393_v33  ;;  %v401_v33 = vand.u32 4294901760, %v400_v57  ;;  %v537_v27 = vand.u32 4294901760, %v536_v43  ;;  %v2806_v57 = vsub.f32 %v249_v5, %v2795_v32  ;;  %v2821_v5 = vand.u32 4294901760, %v267_v44 }
  0xa1   : > { %v2832_v41 = vsub.f32 %v267_v44, %v2821_v5 }
  0xa3   : > { %530 = vmatmul.f32.gmra.mxu2 %v529_v0  ;;  %771 = vmatmul.f32.gmra.mxu3 %v2715_v6  ;;  %v408_v0 = vsub.f32 %v2784_v62, %v3369_v9  ;;  %v3382_v9 = vand.u32 4294901760, %v2806_v57  ;;  %v2839_v6 = vand.u32 4294901760, %v251_v50 }
  0xa5   : > { %707 = vmatmul.f32.gmra.mxu1 %v2730_v38  ;;  %v409_v43 = vand.u32 4294901760, %v408_v0  ;;  %v416_v0 = vsub.f32 %v2806_v57, %v3382_v9  ;;  %v268_v9 = vld [vmem:[%s2266_s7 + $0xf8] sm:$0xff] }
  0xa7   : > { %402 = vmatmul.f32.gmra.mxu0 %v401_v33  ;;  %v2814_v33 = vsub.f32 %v266_v51, %v2803_v16  ;;  %v2828_v51 = vsub.f32 %v250_v35, %v2818_v49  ;;  %v3393_v35 = vand.u32 4294901760, %v2832_v41 }
  0xa9   : > { %3424 = vst [vmem:[#allocation19_spill] sm:$0xff] %v2814_v33 }
  0xab   : > { %538 = vmatmul.f32.gmra.mxu2 %v537_v27  ;;  %775 = vmatmul.f32.gmra.mxu3 %v2733_v28  ;;  %v3385_v27 = vand.u32 4294901760, %v2814_v33  ;;  %v3390_v28 = vand.u32 4294901760, %v2828_v51 }
  0xad   : > { %711 = vmatmul.f32.gmra.mxu1 %v2751_v58  ;;  %v552_v21 = vsub.f32 %v2814_v33, %v3385_v27  ;;  %v424_v44 = vsub.f32 %v2828_v51, %v3390_v28  ;;  %v2850_v27 = vsub.f32 %v251_v50, %v2839_v6  ;;  %v560_v33 = vsub.f32 %v2832_v41, %v3393_v35 }
  0xaf   : > { %410 = vmatmul.f32.gmra.mxu0 %v409_v43  ;;  %v417_v43 = vand.u32 4294901760, %v416_v0  ;;  %v553_v29 = vand.u32 4294901760, %v552_v21  ;;  %v252_v0 = vld [vmem:[%s2266_s7 + $0x78] sm:$0xff]  ;;  %v561_v50 = vand.u32 4294901760, %v560_v33  ;;  %s2079_s7 = scalar_lea.hbm %s3336_s4, 512 }
  0xb0   : > { %v2861_v28 = vand.u32 4294901760, %v252_v0  ;;  %p2081_p9 = scmp.lt.s32.totalorder %s2079_s7, %s2075_s20 }
  0xb2   : > { %v2869_v35 = vsub.f32 %v252_v0, %v2861_v28  ;;  %p2082_p2 = por %p2081_p9, %p2080_p11 }
  0xb3   : > { %546 = vmatmul.f32.gmra.mxu2 %v545_v46  ;;  %779 = vmatmul.f32.gmra.mxu3 %v2759_v45  ;;  %v2847_v46 = vand.u32 4294901760, %v268_v9  ;;  %v425_v45 = vand.u32 4294901760, %v424_v44 }
  0xb4   : > { %v3396_v33 = vand.u32 4294901760, %v2869_v35  ;;  %p2083_p10 = pnand %p2082_p2, %p2078_p8 }
  0xb5   : > { %715 = vmatmul.f32.gmra.mxu1 %v2774_v14  ;;  %3425 = vst [vmem:[#allocation20_spill] sm:$0xff] %v2847_v46  ;;  %v2858_v21 = vsub.f32 %v268_v9, %v2847_v46 }
  0xb7   : > { %418 = vmatmul.f32.gmra.mxu0 %v417_v43  ;;  %3426 = vst [vmem:[#allocation21_spill] sm:$0xff] %v2858_v21  ;;  %v3394_v43 = vand.u32 4294901760, %v2850_v27  ;;  %v3395_v52 = vand.u32 4294901760, %v2858_v21 }
  0xb9   : > { %v568_v9 = vsub.f32 %v2858_v21, %v3395_v52 }
  0xbb   : > { %554 = vmatmul.f32.gmra.mxu2 %v553_v29  ;;  %783 = vmatmul.f32.gmra.mxu3 %v2777_v17  ;;  %v432_v29 = vsub.f32 %v2850_v27, %v3394_v43  ;;  %v440_v43 = vsub.f32 %v2869_v35, %v3396_v33 }
  0xbd   : > { %719 = vmatmul.f32.gmra.mxu1 %v2795_v32  ;;  %v433_v44 = vand.u32 4294901760, %v432_v29  ;;  %v441_v0 = vand.u32 4294901760, %v440_v43  ;;  %v3427_v43 = vand.u32 4294901760, %v2434_v55 }
  0xbf   : > { %426 = vmatmul.f32.gmra.mxu0 %v425_v45  ;;  %v569_v45 = vand.u32 4294901760, %v568_v9 }
  0xc3   : > { %562 = vmatmul.f32.gmra.mxu2 %v561_v50  ;;  %787 = vmatmul.f32.gmra.mxu3 %v2803_v16 }
  0xc5   : > { %723 = vmatmul.f32.gmra.mxu1 %v2818_v49 }
  0xc7   : > { %434 = vmatmul.f32.gmra.mxu0 %v433_v44 }
  0xcb   : > { %570 = vmatmul.f32.gmra.mxu2 %v569_v45  ;;  %791 = vmatmul.f32.gmra.mxu3 %v2821_v5 }
  0xcd   : > { %727 = vmatmul.f32.gmra.mxu1 %v2839_v6 }
  0xcf   : > { %442 = vmatmul.f32.gmra.mxu0 %v441_v0 }
  0xd3   : > { %795 = vmatmul.f32.gmra.mxu3 %v2847_v46  ;;  %849 = vmatmul.f32.vlgmr.msrb.gmra.mxu2 %v2434_v55  ;;  %v3429_v46 = vand.u32 4294901760, %v2476_v61 }
  0xd4   : > { %v2884_v50 = vpop.f32.mrf.mxu0 }
  0xd5   : > { %731 = vmatmul.f32.gmra.mxu1 %v2861_v28 }
  0xd6   : > { %v451_v29 = vpop.f32.mrf.mxu2 }
  0xd7   : > { %1298 = vmatmul.f32.vlgmr.msrb.gmra.mxu0 %v2419_v42 }
  0xda   : > { %v2888_v9 = vpop.f32.mrf.mxu1 }
  0xdb   : > { %854 = vmatmul.f32.gmra.mxu2 %v2476_v61  ;;  %1043 = vmatmul.f32.vlgmr.msrb.gmra.mxu3 %v3427_v43 }
  0xdc   : > { %v2893_v44 = vpop.f32.mrf.mxu0 }
  0xdd   : > { %1459 = vmatmul.f32.vlgmr.msrb.gmra.mxu1 %v2419_v42 }
  0xde   : > { %v459_v45 = vpop.f32.mrf.mxu2  ;;  %v736_v0 = vpop.f32.mrf.mxu3 }
  0xdf   : > { %v2896_v52 = vadd.f32 %v736_v0, %v451_v29  ;;  %1302 = vmatmul.f32.gmra.mxu0 %v2455_v25  ;;  %v3431_v0 = vand.u32 4294901760, %v2508_v63 }
  0xe1   : > { %3428 = vst [vmem:[#allocation22_spill] sm:$0xff] %v2896_v52 }
  0xe2   : > { %v2899_v33 = vpop.f32.mrf.mxu1 }
  0xe3   : > { %859 = vmatmul.f32.gmra.mxu2 %v2508_v63  ;;  %1049 = vmatmul.f32.gmra.mxu3 %v3429_v46 }
  0xe4   : > { %v2904_v21 = vpop.f32.mrf.mxu0 }
  0xe5   : > { %1463 = vmatmul.f32.gmra.mxu1 %v2455_v25 }
  0xe6   : > { %v467_v55 = vpop.f32.mrf.mxu2  ;;  %v740_v43 = vpop.f32.mrf.mxu3 }
  0xe7   : > { %v2907_v42 = vadd.f32 %v740_v43, %v459_v45  ;;  %1306 = vmatmul.f32.gmra.mxu0 %v2496_v39  ;;  %v3433_v43 = vand.u32 4294901760, %v2540_v54 }
  0xe9   : > { %3430 = vst [vmem:[#allocation23_spill] sm:$0xff] %v2907_v42 }
  0xea   : > { %v2910_v29 = vpop.f32.mrf.mxu1 }
  0xeb   : > { %864 = vmatmul.f32.gmra.mxu2 %v2540_v54  ;;  %1055 = vmatmul.f32.gmra.mxu3 %v3431_v0 }
  0xec   : > { %v2915_v52 = vpop.f32.mrf.mxu0 }
  0xed   : > { %1467 = vmatmul.f32.gmra.mxu1 %v2496_v39 }
  0xee   : > { %v475_v61 = vpop.f32.mrf.mxu2  ;;  %v744_v46 = vpop.f32.mrf.mxu3 }
  0xef   : > { %v2918_v25 = vadd.f32 %v744_v46, %v467_v55  ;;  %1310 = vmatmul.f32.gmra.mxu0 %v2525_v2  ;;  %v3435_v46 = vand.u32 4294901760, %v2575_v19 }
  0xf1   : > { %3432 = vst [vmem:[#allocation24_spill] sm:$0xff] %v2918_v25 }
  0xf2   : > { %v2921_v45 = vpop.f32.mrf.mxu1 }
  0xf3   : > { %869 = vmatmul.f32.gmra.mxu2 %v2575_v19  ;;  %1061 = vmatmul.f32.gmra.mxu3 %v3433_v43 }
  0xf4   : > { %v2926_v42 = vpop.f32.mrf.mxu0 }
  0xf5   : > { %1471 = vmatmul.f32.gmra.mxu1 %v2525_v2 }
  0xf6   : > { %v483_v63 = vpop.f32.mrf.mxu2  ;;  %v748_v0 = vpop.f32.mrf.mxu3 }
  0xf7   : > { %v2929_v39 = vadd.f32 %v748_v0, %v475_v61  ;;  %1314 = vmatmul.f32.gmra.mxu0 %v2558_v23  ;;  %v3437_v0 = vand.u32 4294901760, %v2612_v36 }
  0xf9   : > { %3434 = vst [vmem:[#allocation25_spill] sm:$0xff] %v2929_v39 }
  0xfa   : > { %v2932_v55 = vpop.f32.mrf.mxu1 }
  0xfb   : > { %874 = vmatmul.f32.gmra.mxu2 %v2612_v36  ;;  %1067 = vmatmul.f32.gmra.mxu3 %v3435_v46 }
  0xfc   : > { %v2937_v25 = vpop.f32.mrf.mxu0 }
  0xfd   : > { %1475 = vmatmul.f32.gmra.mxu1 %v2558_v23 }
  0xfe   : > { %v491_v54 = vpop.f32.mrf.mxu2  ;;  %v752_v43 = vpop.f32.mrf.mxu3 }
  0xff   : > { %v2940_v2 = vadd.f32 %v752_v43, %v483_v63  ;;  %1318 = vmatmul.f32.gmra.mxu0 %v2596_v3  ;;  %v3439_v43 = vand.u32 4294901760, %v2649_v53 }
 0x101   : > { %3436 = vst [vmem:[#allocation26_spill] sm:$0xff] %v2940_v2 }
 0x102   : > { %v2943_v61 = vpop.f32.mrf.mxu1 }
 0x103   : > { %879 = vmatmul.f32.gmra.mxu2 %v2649_v53  ;;  %1073 = vmatmul.f32.gmra.mxu3 %v3437_v0 }
 0x104   : > { %v2948_v39 = vpop.f32.mrf.mxu0 }
 0x105   : > { %1479 = vmatmul.f32.gmra.mxu1 %v2596_v3 }
 0x106   : > { %v499_v19 = vpop.f32.mrf.mxu2  ;;  %v756_v46 = vpop.f32.mrf.mxu3 }
 0x107   : > { %v2951_v23 = vadd.f32 %v756_v46, %v491_v54  ;;  %1322 = vmatmul.f32.gmra.mxu0 %v2632_v22  ;;  %v3441_v46 = vand.u32 4294901760, %v2686_v37 }
 0x109   : > { %3438 = vst [vmem:[#allocation27_spill] sm:$0xff] %v2951_v23 }
 0x10a   : > { %v2954_v63 = vpop.f32.mrf.mxu1 }
 0x10b   : > { %884 = vmatmul.f32.gmra.mxu2 %v2686_v37  ;;  %1079 = vmatmul.f32.gmra.mxu3 %v3439_v43 }
 0x10c   : > { %v2959_v2 = vpop.f32.mrf.mxu0 }
 0x10d   : > { %1483 = vmatmul.f32.gmra.mxu1 %v2632_v22 }
 0x10e   : > { %v507_v36 = vpop.f32.mrf.mxu2  ;;  %v760_v0 = vpop.f32.mrf.mxu3 }
 0x10f   : > { %v2962_v3 = vadd.f32 %v760_v0, %v499_v19  ;;  %1326 = vmatmul.f32.gmra.mxu0 %v2670_v24  ;;  %v3443_v0 = vand.u32 4294901760, %v2718_v20 }
 0x111   : > { %3440 = vst [vmem:[#allocation28_spill] sm:$0xff] %v2962_v3 }
 0x112   : > { %v2965_v54 = vpop.f32.mrf.mxu1 }
 0x113   : > { %889 = vmatmul.f32.gmra.mxu2 %v2718_v20  ;;  %1085 = vmatmul.f32.gmra.mxu3 %v3441_v46 }
 0x114   : > { %v2970_v23 = vpop.f32.mrf.mxu0 }
 0x115   : > { %1487 = vmatmul.f32.gmra.mxu1 %v2670_v24 }
 0x116   : > { %v515_v53 = vpop.f32.mrf.mxu2  ;;  %v764_v43 = vpop.f32.mrf.mxu3 }
 0x117   : > { %v2973_v22 = vadd.f32 %v764_v43, %v507_v36  ;;  %1330 = vmatmul.f32.gmra.mxu0 %v2704_v26  ;;  %v3445_v43 = vand.u32 4294901760, %v2740_v60 }
 0x119   : > { %3442 = vst [vmem:[#allocation29_spill] sm:$0xff] %v2973_v22 }
 0x11a   : > { %v2976_v19 = vpop.f32.mrf.mxu1 }
 0x11b   : > { %894 = vmatmul.f32.gmra.mxu2 %v2740_v60  ;;  %1091 = vmatmul.f32.gmra.mxu3 %v3443_v0 }
 0x11c   : > { %v2981_v3 = vpop.f32.mrf.mxu0 }
 0x11d   : > { %1491 = vmatmul.f32.gmra.mxu1 %v2704_v26 }
 0x11e   : > { %v523_v37 = vpop.f32.mrf.mxu2  ;;  %v768_v46 = vpop.f32.mrf.mxu3 }
 0x11f   : > { %v2984_v24 = vadd.f32 %v768_v46, %v515_v53  ;;  %1334 = vmatmul.f32.gmra.mxu0 %v2730_v38  ;;  %v3447_v46 = vand.u32 4294901760, %v2762_v40 }
 0x121   : > { %3444 = vst [vmem:[#allocation30_spill] sm:$0xff] %v2984_v24 }
 0x122   : > { %v2987_v36 = vpop.f32.mrf.mxu1 }
 0x123   : > { %899 = vmatmul.f32.gmra.mxu2 %v2762_v40  ;;  %1097 = vmatmul.f32.gmra.mxu3 %v3445_v43 }
 0x124   : > { %v2992_v22 = vpop.f32.mrf.mxu0 }
 0x125   : > { %1495 = vmatmul.f32.gmra.mxu1 %v2730_v38 }
 0x126   : > { %v531_v20 = vpop.f32.mrf.mxu2  ;;  %v772_v0 = vpop.f32.mrf.mxu3 }
 0x127   : > { %v2995_v26 = vadd.f32 %v772_v0, %v523_v37  ;;  %1338 = vmatmul.f32.gmra.mxu0 %v2751_v58  ;;  %v3449_v0 = vand.u32 4294901760, %v2784_v62 }
 0x129   : > { %3446 = vst [vmem:[#allocation31_spill] sm:$0xff] %v2995_v26 }
 0x12a   : > { %v2998_v53 = vpop.f32.mrf.mxu1 }
 0x12b   : > { %904 = vmatmul.f32.gmra.mxu2 %v2784_v62  ;;  %1103 = vmatmul.f32.gmra.mxu3 %v3447_v46 }
 0x12c   : > { %v3003_v24 = vpop.f32.mrf.mxu0 }
 0x12d   : > { %1499 = vmatmul.f32.gmra.mxu1 %v2751_v58 }
 0x12e   : > { %v539_v60 = vpop.f32.mrf.mxu2  ;;  %v776_v43 = vpop.f32.mrf.mxu3 }
 0x12f   : > { %v3006_v38 = vadd.f32 %v776_v43, %v531_v20  ;;  %1342 = vmatmul.f32.gmra.mxu0 %v2774_v14  ;;  %v3451_v43 = vand.u32 4294901760, %v2806_v57 }
 0x131   : > { %3448 = vst [vmem:[#allocation32_spill] sm:$0xff] %v3006_v38 }
 0x132   : > { %v3009_v37 = vpop.f32.mrf.mxu1 }
 0x133   : > { %909 = vmatmul.f32.gmra.mxu2 %v2806_v57  ;;  %1109 = vmatmul.f32.gmra.mxu3 %v3449_v0 }
 0x134   : > { %v3014_v26 = vpop.f32.mrf.mxu0 }
 0x135   : > { %1503 = vmatmul.f32.gmra.mxu1 %v2774_v14 }
 0x136   : > { %v547_v40 = vpop.f32.mrf.mxu2  ;;  %v780_v46 = vpop.f32.mrf.mxu3 }
 0x137   : > { %v3017_v58 = vadd.f32 %v780_v46, %v539_v60  ;;  %1346 = vmatmul.f32.gmra.mxu0 %v2795_v32  ;;  %v3453_v46 = vand.u32 4294901760, %v2828_v51 }
 0x139   : > { %3450 = vst [vmem:[#allocation33_spill] sm:$0xff] %v3017_v58 }
 0x13a   : > { %v3020_v20 = vpop.f32.mrf.mxu1 }
 0x13b   : > { %914 = vmatmul.f32.gmra.mxu2 %v2828_v51  ;;  %1115 = vmatmul.f32.gmra.mxu3 %v3451_v43 }
 0x13c   : > { %v3025_v38 = vpop.f32.mrf.mxu0 }
 0x13d   : > { %1507 = vmatmul.f32.gmra.mxu1 %v2795_v32 }
 0x13e   : > { %v555_v62 = vpop.f32.mrf.mxu2  ;;  %v784_v0 = vpop.f32.mrf.mxu3 }
 0x13f   : > { %v3028_v14 = vadd.f32 %v784_v0, %v547_v40  ;;  %1350 = vmatmul.f32.gmra.mxu0 %v2818_v49  ;;  %v3455_v0 = vand.u32 4294901760, %v2850_v27 }
 0x141   : > { %3452 = vst [vmem:[#allocation34_spill] sm:$0xff] %v3028_v14 }
 0x142   : > { %v3031_v60 = vpop.f32.mrf.mxu1 }
 0x143   : > { %919 = vmatmul.f32.gmra.mxu2 %v2850_v27  ;;  %1121 = vmatmul.f32.gmra.mxu3 %v3453_v46 }
 0x144   : > { %v3036_v58 = vpop.f32.mrf.mxu0 }
 0x145   : > { %1511 = vmatmul.f32.gmra.mxu1 %v2818_v49 }
 0x146   : > { %v563_v57 = vpop.f32.mrf.mxu2  ;;  %v788_v43 = vpop.f32.mrf.mxu3 }
 0x147   : > { %v3039_v32 = vadd.f32 %v788_v43, %v555_v62  ;;  %1354 = vmatmul.f32.gmra.mxu0 %v2839_v6  ;;  %v3459_v43 = vand.u32 4294901760, %v2869_v35 }
 0x149   : > { %3454 = vst [vmem:[#allocation35_spill] sm:$0xff] %v3039_v32 }
 0x14a   : > { %v3042_v40 = vpop.f32.mrf.mxu1 }
 0x14b   : > { %924 = vmatmul.f32.gmra.mxu2 %v2869_v35  ;;  %1127 = vmatmul.f32.gmra.mxu3 %v3455_v0 }
 0x14c   : > { %v3047_v14 = vpop.f32.mrf.mxu0 }
 0x14d   : > { %3456 = vst [vmem:[#allocation36_spill] sm:$0xff] %v3047_v14  ;;  %1515 = vmatmul.f32.gmra.mxu1 %v2839_v6 }
 0x14e   : > { %v571_v51 = vpop.f32.mrf.mxu2  ;;  %v792_v46 = vpop.f32.mrf.mxu3 }
 0x14f   : > { %v3050_v49 = vadd.f32 %v792_v46, %v563_v57  ;;  %1358 = vmatmul.f32.gmra.mxu0 %v2861_v28  ;;  %v673_v57 = vadd.f32 %v2888_v9, %v2884_v50  ;;  %v3460_v46 = vand.u32 4294901760, %v2397_v8 }
 0x151   : > { %3457 = vst [vmem:[#allocation37_spill] sm:$0xff] %v3050_v49 }
 0x152   : > { %v3053_v62 = vpop.f32.mrf.mxu1 }
 0x153   : > { %3458 = vst [vmem:[#allocation38_spill] sm:$0xff] %v3053_v62  ;;  %929 = vmatmul.f32.gmra.mxu2 %v2397_v8  ;;  %1133 = vmatmul.f32.gmra.mxu3 %v3459_v43  ;;  %v677_v8 = vadd.f32 %v2899_v33, %v2893_v44 }
 0x154   : > { %v1299_v32 = vpop.f32.mrf.mxu0 }
 0x155   : > { %1519 = vmatmul.f32.gmra.mxu1 %v2861_v28 }
 0x156   : > { %v796_v27 = vpop.f32.mrf.mxu3  ;;  %v850_v0 = vpop.f32.mrf.mxu2 }
 0x157   : > { %v3059_v14 = vadd.f32 %v796_v27, %v571_v51  ;;  %1362 = vmatmul.f32.gmra.mxu0 %v2370_v56  ;;  %v851_v43 = vadd.f32 %v850_v0, %v673_v57  ;;  %v3072_v27 = vld [vmem:[%s3334_s2] ss:$0 sm:$0xff] }
 0x15a   : > { %v1460_v6 = vpop.f32.mrf.mxu1 }
 0x15b   : > { %934 = vmatmul.f32.gmra.mxu2 %v2451_v12  ;;  %1139 = vmatmul.f32.gmra.mxu3 %v3460_v46 }
 0x15c   : > { %v1303_v35 = vpop.f32.mrf.mxu0 }
 0x15d   : > { %1523 = vmatmul.f32.gmra.mxu1 %v2370_v56  ;;  %v3079_v56 = vld [vmem:[%s3335_s3] ss:$0 sm:$0xff] }
 0x15e   : > { %v855_v28 = vpop.f32.mrf.mxu2  ;;  %v1044_v49 = vpop.f32.mrf.mxu3 }
 0x15f   : > { %v1045_v62 = vadd.f32 %v1044_v49, %v851_v43  ;;  %1366 = vmatmul.f32.gmra.mxu0 %v2423_v47  ;;  %v3461_v49 = vand.u32 4294901760, %v2451_v12  ;;  %v681_v12 = vadd.f32 %v2910_v29, %v2904_v21 }
 0x161   : > { %v1300_v51 = vadd.f32 %v1299_v32, %v1045_v62  ;;  %v856_v62 = vadd.f32 %v855_v28, %v677_v8 }
 0x162   : > { %v1464_v50 = vpop.f32.mrf.mxu1 }
 0x163   : > { %v1461_v9 = vadd.f32 %v1460_v6, %v1300_v51  ;;  %939 = vmatmul.f32.gmra.mxu2 %v2489_v48  ;;  %1145 = vmatmul.f32.gmra.mxu3 %v3461_v49 }
 0x164   : > { %v1307_v32 = vpop.f32.mrf.mxu0 }
 0x165   : > { %v1591_v0 = vmul.f32 %v3072_v27, %v1461_v9  ;;  %1527 = vmatmul.f32.gmra.mxu1 %v2423_v47  ;;  %v3462_v47 = vand.u32 4294901760, %v2489_v48 }
 0x166   : > { %v860_v57 = vpop.f32.mrf.mxu2  ;;  %v1050_v33 = vpop.f32.mrf.mxu3 }
 0x167   : > { %v1627_v44 = vadd.f32 %v3079_v56, %v1591_v0  ;;  %v1051_v6 = vadd.f32 %v1050_v33, %v856_v62  ;;  %1370 = vmatmul.f32.gmra.mxu0 %v2468_v1  ;;  %v861_v49 = vadd.f32 %v860_v57, %v681_v12 }
 0x169   : > { %vm1659_vm0 = vcmp.ge.f32.partialorder %v1627_v44, 0.0  ;;  %v1691_v46 = vmul.f32 0.01, %v1627_v44  ;;  %v1304_v43 = vadd.f32 %v1303_v35, %v1051_v6 }
 0x16a   : > { %v1468_v51 = vpop.f32.mrf.mxu1 }
 0x16b   : > { %v1723_v28 = vsel %vm1659_vm0, %v1627_v44, %v1691_v46  ;;  %v1465_v8 = vadd.f32 %v1464_v50, %v1304_v43  ;;  %944 = vmatmul.f32.gmra.mxu2 %v2515_v13  ;;  %1151 = vmatmul.f32.gmra.mxu3 %v3462_v47  ;;  %v685_v44 = vadd.f32 %v2921_v45, %v2915_v52 }
 0x16c   : > { %1755 = vst [vmem:[%s3095_s23] sm:$0xff] %v1723_v28  ;;  %v1311_v9 = vpop.f32.mrf.mxu0  ;;  %v689_v47 = vadd.f32 %v2932_v55, %v2926_v42 }
 0x16d   : > { %v1592_v35 = vmul.f32 %v3072_v27, %v1465_v8  ;;  %1531 = vmatmul.f32.gmra.mxu1 %v2468_v1  ;;  %v3463_v1 = vand.u32 4294901760, %v2515_v13 }
 0x16e   : > { %v865_v21 = vpop.f32.mrf.mxu2  ;;  %v1056_v29 = vpop.f32.mrf.mxu3 }
 0x16f   : > { %v1628_v50 = vadd.f32 %v3079_v56, %v1592_v35  ;;  %v1057_v62 = vadd.f32 %v1056_v29, %v861_v49  ;;  %1374 = vmatmul.f32.gmra.mxu0 %v2501_v34  ;;  %v866_v43 = vadd.f32 %v865_v21, %v685_v44 }
 0x171   : > { %vm1660_vm1 = vcmp.ge.f32.partialorder %v1628_v50, 0.0  ;;  %v1692_v48 = vmul.f32 0.01, %v1628_v50  ;;  %v1308_v0 = vadd.f32 %v1307_v32, %v1057_v62 }
 0x172   : > { %v1472_v33 = vpop.f32.mrf.mxu1 }
 0x173   : > { %v1724_v57 = vsel %vm1660_vm1, %v1628_v50, %v1692_v48  ;;  %v1469_v6 = vadd.f32 %v1468_v51, %v1308_v0  ;;  %949 = vmatmul.f32.gmra.mxu2 %v2549_v30  ;;  %1157 = vmatmul.f32.gmra.mxu3 %v3463_v1 }
 0x174   : > { %1756 = vst [vmem:[%s3095_s23 + $0x8] sm:$0xff] %v1724_v57  ;;  %v1315_v46 = vpop.f32.mrf.mxu0 }
 0x175   : > { %v1593_v12 = vmul.f32 %v3072_v27, %v1469_v6  ;;  %1535 = vmatmul.f32.gmra.mxu1 %v2501_v34  ;;  %v3464_v34 = vand.u32 4294901760, %v2549_v30 }
 0x176   : > { %v870_v32 = vpop.f32.mrf.mxu2  ;;  %v1062_v28 = vpop.f32.mrf.mxu3 }
 0x177   : > { %v1629_v8 = vadd.f32 %v3079_v56, %v1593_v12  ;;  %v1063_v52 = vadd.f32 %v1062_v28, %v866_v43  ;;  %1378 = vmatmul.f32.gmra.mxu0 %v2532_v15  ;;  %v871_v29 = vadd.f32 %v870_v32, %v689_v47 }
 0x179   : > { %vm1661_vm2 = vcmp.ge.f32.partialorder %v1629_v8, 0.0  ;;  %v1693_v45 = vmul.f32 0.01, %v1629_v8  ;;  %v1312_v51 = vadd.f32 %v1311_v9, %v1063_v52 }
 0x17a   : > { %v1476_v13 = vpop.f32.mrf.mxu1 }
 0x17b   : > { %v1725_v49 = vsel %vm1661_vm2, %v1629_v8, %v1693_v45  ;;  %v1473_v35 = vadd.f32 %v1472_v33, %v1312_v51  ;;  %954 = vmatmul.f32.gmra.mxu2 %v2592_v10  ;;  %1163 = vmatmul.f32.gmra.mxu3 %v3464_v34  ;;  %v693_v33 = vadd.f32 %v2943_v61, %v2937_v25 }
 0x17c   : > { %1757 = vst [vmem:[%s3095_s23 + $0x10] sm:$0xff] %v1725_v49  ;;  %v1319_v21 = vpop.f32.mrf.mxu0  ;;  %v697_v8 = vadd.f32 %v2954_v63, %v2948_v39 }
 0x17d   : > { %v1594_v50 = vmul.f32 %v3072_v27, %v1473_v35  ;;  %1539 = vmatmul.f32.gmra.mxu1 %v2532_v15  ;;  %v3465_v15 = vand.u32 4294901760, %v2592_v10 }
 0x17e   : > { %v875_v9 = vpop.f32.mrf.mxu2  ;;  %v1068_v62 = vpop.f32.mrf.mxu3 }
 0x17f   : > { %v1630_v48 = vadd.f32 %v3079_v56, %v1594_v50  ;;  %v1069_v42 = vadd.f32 %v1068_v62, %v871_v29  ;;  %1382 = vmatmul.f32.gmra.mxu0 %v2572_v31  ;;  %v876_v1 = vadd.f32 %v875_v9, %v693_v33  ;;  %v701_v29 = vadd.f32 %v2965_v54, %v2959_v2  ;;  %v3468_v54 = vld [vmem:[#allocation11_spill] sm:$0xff] }
 0x181   : > { %vm1662_vm3 = vcmp.ge.f32.partialorder %v1630_v48, 0.0  ;;  %v1694_v55 = vmul.f32 0.01, %v1630_v48  ;;  %v1316_v0 = vadd.f32 %v1315_v46, %v1069_v42 }
 0x182   : > { %v1480_v30 = vpop.f32.mrf.mxu1 }
 0x183   : > { %v1726_v44 = vsel %vm1662_vm3, %v1630_v48, %v1694_v55  ;;  %v1477_v57 = vadd.f32 %v1476_v13, %v1316_v0  ;;  %959 = vmatmul.f32.gmra.mxu2 %v2622_v18  ;;  %1169 = vmatmul.f32.gmra.mxu3 %v3465_v15 }
 0x184   : > { %1758 = vst [vmem:[%s3095_s23 + $0x18] sm:$0xff] %v1726_v44  ;;  %v1323_v6 = vpop.f32.mrf.mxu0 }
 0x185   : > { %v1595_v43 = vmul.f32 %v3072_v27, %v1477_v57  ;;  %1543 = vmatmul.f32.gmra.mxu1 %v2572_v31  ;;  %v3466_v31 = vand.u32 4294901760, %v2622_v18  ;;  %v705_v57 = vadd.f32 %v2976_v19, %v2970_v23  ;;  %v3471_v19 = vld [vmem:[#allocation12_spill] sm:$0xff] }
 0x186   : > { %v880_v46 = vpop.f32.mrf.mxu2  ;;  %v1074_v12 = vpop.f32.mrf.mxu3 }
 0x187   : > { %v1631_v32 = vadd.f32 %v3079_v56, %v1595_v43  ;;  %v1075_v25 = vadd.f32 %v1074_v12, %v876_v1  ;;  %1386 = vmatmul.f32.gmra.mxu0 %v2603_v11  ;;  %v881_v13 = vadd.f32 %v880_v46, %v697_v8  ;;  %v3469_v1 = vld [vmem:[#allocation13_spill] sm:$0xff]  ;;  %v709_v8 = vadd.f32 %v2987_v36, %v2981_v3  ;;  %v3474_v36 = vld [vmem:[#allocation14_spill] sm:$0xff] }
 0x189   : > { %vm1663_vm4 = vcmp.ge.f32.partialorder %v1631_v32, 0.0  ;;  %v1695_v61 = vmul.f32 0.01, %v1631_v32  ;;  %v1320_v28 = vadd.f32 %v1319_v21, %v1075_v25 }
 0x18a   : > { %v1484_v10 = vpop.f32.mrf.mxu1 }
 0x18b   : > { %v1727_v52 = vsel %vm1663_vm4, %v1631_v32, %v1695_v61  ;;  %v1481_v45 = vadd.f32 %v1480_v30, %v1320_v28  ;;  %964 = vmatmul.f32.gmra.mxu2 %v2666_v7  ;;  %1175 = vmatmul.f32.gmra.mxu3 %v3466_v31  ;;  %v3472_v31 = vld [vmem:[#allocation15_spill] sm:$0xff] }
 0x18c   : > { %1759 = vst [vmem:[%s3095_s23 + $0x20] sm:$0xff] %v1727_v52  ;;  %v1327_v51 = vpop.f32.mrf.mxu0 }
 0x18d   : > { %v1596_v47 = vmul.f32 %v3072_v27, %v1481_v45  ;;  %1547 = vmatmul.f32.gmra.mxu1 %v2603_v11  ;;  %v3467_v11 = vand.u32 4294901760, %v2666_v7 }
 0x18e   : > { %v885_v49 = vpop.f32.mrf.mxu2  ;;  %v1080_v35 = vpop.f32.mrf.mxu3 }
 0x18f   : > { %v1632_v34 = vadd.f32 %v3079_v56, %v1596_v47  ;;  %v1081_v39 = vadd.f32 %v1080_v35, %v881_v13  ;;  %1390 = vmatmul.f32.gmra.mxu0 %v2646_v4  ;;  %v886_v48 = vadd.f32 %v885_v49, %v701_v29  ;;  %v713_v29 = vadd.f32 %v2998_v53, %v2992_v22  ;;  %v3477_v53 = vld [vmem:[#allocation16_spill] sm:$0xff] }
 0x191   : > { %vm1664_vm5 = vcmp.ge.f32.partialorder %v1632_v34, 0.0  ;;  %v1696_v63 = vmul.f32 0.01, %v1632_v34  ;;  %v1324_v21 = vadd.f32 %v1323_v6, %v1081_v39 }
 0x192   : > { %v1488_v18 = vpop.f32.mrf.mxu1 }
 0x193   : > { %v1728_v50 = vsel %vm1664_vm5, %v1632_v34, %v1696_v63  ;;  %v1485_v9 = vadd.f32 %v1484_v10, %v1324_v21  ;;  %969 = vmatmul.f32.gmra.mxu2 %v2694_v59  ;;  %1181 = vmatmul.f32.gmra.mxu3 %v3467_v11  ;;  %v3475_v11 = vld [vmem:[#allocation17_spill] sm:$0xff] }
 0x194   : > { %1760 = vst [vmem:[%s3095_s23 + $0x28] sm:$0xff] %v1728_v50  ;;  %v1331_v62 = vpop.f32.mrf.mxu0 }
 0x195   : > { %v1597_v42 = vmul.f32 %v3072_v27, %v1485_v9  ;;  %1551 = vmatmul.f32.gmra.mxu1 %v2646_v4  ;;  %v3470_v4 = vand.u32 4294901760, %v2694_v59 }
 0x196   : > { %v890_v55 = vpop.f32.mrf.mxu2  ;;  %v1086_v0 = vpop.f32.mrf.mxu3 }
 0x197   : > { %v1633_v30 = vadd.f32 %v3079_v56, %v1597_v42  ;;  %v1087_v2 = vadd.f32 %v1086_v0, %v886_v48  ;;  %1394 = vmatmul.f32.gmra.mxu0 %v3468_v54  ;;  %v891_v46 = vadd.f32 %v890_v55, %v705_v57 }
 0x199   : > { %vm1665_vm6 = vcmp.ge.f32.partialorder %v1633_v30, 0.0  ;;  %v1697_v33 = vmul.f32 0.01, %v1633_v30  ;;  %v1328_v44 = vadd.f32 %v1327_v51, %v1087_v2  ;;  %v3473_v51 = vand.u32 4294901760, %v3469_v1 }
 0x19a   : > { %v1492_v7 = vpop.f32.mrf.mxu1 }
 0x19b   : > { %v1729_v15 = vsel %vm1665_vm6, %v1633_v30, %v1697_v33  ;;  %v1489_v6 = vadd.f32 %v1488_v18, %v1328_v44  ;;  %974 = vmatmul.f32.gmra.mxu2 %v3469_v1  ;;  %1187 = vmatmul.f32.gmra.mxu3 %v3470_v4  ;;  %v3479_v1 = vand.u32 4294901760, %v3475_v11 }
 0x19c   : > { %1761 = vst [vmem:[%s3095_s23 + $0x30] sm:$0xff] %v1729_v15  ;;  %v1335_v43 = vpop.f32.mrf.mxu0 }
 0x19d   : > { %v1598_v12 = vmul.f32 %v3072_v27, %v1489_v6  ;;  %1555 = vmatmul.f32.gmra.mxu1 %v3468_v54  ;;  %v3478_v6 = vld [vmem:[#allocation18_spill] sm:$0xff] }
 0x19e   : > { %v895_v32 = vpop.f32.mrf.mxu2  ;;  %v1092_v25 = vpop.f32.mrf.mxu3 }
 0x19f   : > { %v1634_v61 = vadd.f32 %v3079_v56, %v1598_v12  ;;  %v1093_v23 = vadd.f32 %v1092_v25, %v891_v46  ;;  %1398 = vmatmul.f32.gmra.mxu0 %v3471_v19  ;;  %v896_v47 = vadd.f32 %v895_v32, %v709_v8  ;;  %v3481_v8 = vand.u32 4294901760, %v3478_v6 }
 0x1a1   : > { %vm1666_vm7 = vcmp.ge.f32.partialorder %v1634_v61, 0.0  ;;  %v1698_v28 = vmul.f32 0.01, %v1634_v61  ;;  %v1332_v10 = vadd.f32 %v1331_v62, %v1093_v23  ;;  %v3476_v62 = vand.u32 4294901760, %v3472_v31 }
 0x1a2   : > { %v1496_v59 = vpop.f32.mrf.mxu1 }
 0x1a3   : > { %v1730_v52 = vsel %vm1666_vm7, %v1634_v61, %v1698_v28  ;;  %v1493_v45 = vadd.f32 %v1492_v7, %v1332_v10  ;;  %979 = vmatmul.f32.gmra.mxu2 %v3472_v31  ;;  %1193 = vmatmul.f32.gmra.mxu3 %v3473_v51  ;;  %v717_v7 = vadd.f32 %v3009_v37, %v3003_v24 }
 0x1a4   : > { %1762 = vst [vmem:[%s3095_s23 + $0x38] sm:$0xff] %v1730_v52  ;;  %v1339_v13 = vpop.f32.mrf.mxu0 }
 0x1a5   : > { %v1599_v49 = vmul.f32 %v3072_v27, %v1493_v45  ;;  %1559 = vmatmul.f32.gmra.mxu1 %v3471_v19  ;;  %v721_v19 = vadd.f32 %v3020_v20, %v3014_v26 }
 0x1a6   : > { %v900_v35 = vpop.f32.mrf.mxu2  ;;  %v1098_v34 = vpop.f32.mrf.mxu3 }
 0x1a7   : > { %v1635_v39 = vadd.f32 %v3079_v56, %v1599_v49  ;;  %v1099_v3 = vadd.f32 %v1098_v34, %v896_v47  ;;  %1402 = vmatmul.f32.gmra.mxu0 %v3474_v36  ;;  %v901_v42 = vadd.f32 %v900_v35, %v713_v29  ;;  %v725_v34 = vadd.f32 %v3031_v60, %v3025_v38 }
 0x1a9   : > { %vm1667_vm8 = vcmp.ge.f32.partialorder %v1635_v39, 0.0  ;;  %v1699_v63 = vmul.f32 0.01, %v1635_v39  ;;  %v1336_v21 = vadd.f32 %v1335_v43, %v1099_v3 }
 0x1aa   : > { %v1500_v18 = vpop.f32.mrf.mxu1 }
 0x1ab   : > { %v1731_v50 = vsel %vm1667_vm8, %v1635_v39, %v1699_v63  ;;  %v1497_v9 = vadd.f32 %v1496_v59, %v1336_v21  ;;  %984 = vmatmul.f32.gmra.mxu2 %v3475_v11  ;;  %1199 = vmatmul.f32.gmra.mxu3 %v3476_v62  ;;  %v3480_v59 = vld [vmem:[#allocation19_spill] sm:$0xff]  ;;  %v729_v62 = vadd.f32 %v3042_v40, %v3036_v58  ;;  %v3485_v40 = vld [vmem:[#allocation20_spill] sm:$0xff] }
 0x1ac   : > { %1763 = vst [vmem:[%s3095_s23 + $0x40] sm:$0xff] %v1731_v50  ;;  %v1343_v48 = vpop.f32.mrf.mxu0 }
 0x1ad   : > { %v1600_v55 = vmul.f32 %v3072_v27, %v1497_v9  ;;  %1563 = vmatmul.f32.gmra.mxu1 %v3474_v36 }
 0x1ae   : > { %v905_v0 = vpop.f32.mrf.mxu2  ;;  %v1104_v30 = vpop.f32.mrf.mxu3 }
 0x1af   : > { %v1636_v2 = vadd.f32 %v3079_v56, %v1600_v55  ;;  %v1105_v22 = vadd.f32 %v1104_v30, %v901_v42  ;;  %1406 = vmatmul.f32.gmra.mxu0 %v3477_v53  ;;  %v906_v43 = vadd.f32 %v905_v0, %v717_v7  ;;  %v3483_v55 = vld [vmem:[#allocation21_spill] sm:$0xff]  ;;  %v3486_v7 = vld [vmem:[#allocation36_spill] sm:$0xff] }
 0x1b1   : > { %vm1668_vm9 = vcmp.ge.f32.partialorder %v1636_v2, 0.0  ;;  %v1700_v54 = vmul.f32 0.01, %v1636_v2  ;;  %v1340_v33 = vadd.f32 %v1339_v13, %v1105_v22 }
 0x1b2   : > { %v1504_v44 = vpop.f32.mrf.mxu1 }
 0x1b3   : > { %v1732_v57 = vsel %vm1668_vm9, %v1636_v2, %v1700_v54  ;;  %v1501_v15 = vadd.f32 %v1500_v18, %v1340_v33  ;;  %989 = vmatmul.f32.gmra.mxu2 %v3478_v6  ;;  %1205 = vmatmul.f32.gmra.mxu3 %v3479_v1 }
 0x1b4   : > { %1764 = vst [vmem:[%s3095_s23 + $0x48] sm:$0xff] %v1732_v57  ;;  %v1347_v4 = vpop.f32.mrf.mxu0  ;;  %v3487_v57 = vld [vmem:[#allocation38_spill] sm:$0xff] }
 0x1b5   : > { %v1601_v46 = vmul.f32 %v3072_v27, %v1501_v15  ;;  %1567 = vmatmul.f32.gmra.mxu1 %v3477_v53  ;;  %v733_v15 = vadd.f32 %v3487_v57, %v3486_v7 }
 0x1b6   : > { %v910_v12 = vpop.f32.mrf.mxu2  ;;  %v1110_v32 = vpop.f32.mrf.mxu3 }
 0x1b7   : > { %v1637_v25 = vadd.f32 %v3079_v56, %v1601_v46  ;;  %v1111_v24 = vadd.f32 %v1110_v32, %v906_v43  ;;  %1410 = vmatmul.f32.gmra.mxu0 %v2777_v17  ;;  %v911_v45 = vadd.f32 %v910_v12, %v721_v19 }
 0x1b9   : > { %vm1669_vm10 = vcmp.ge.f32.partialorder %v1637_v25, 0.0  ;;  %v1701_v37 = vmul.f32 0.01, %v1637_v25  ;;  %v1344_v61 = vadd.f32 %v1343_v48, %v1111_v24 }
 0x1ba   : > { %v1508_v23 = vpop.f32.mrf.mxu1 }
 0x1bb   : > { %v1733_v28 = vsel %vm1669_vm10, %v1637_v25, %v1701_v37  ;;  %v1505_v10 = vadd.f32 %v1504_v44, %v1344_v61  ;;  %994 = vmatmul.f32.gmra.mxu2 %v3480_v59  ;;  %1211 = vmatmul.f32.gmra.mxu3 %v3481_v8 }
 0x1bc   : > { %1765 = vst [vmem:[%s3095_s23 + $0x50] sm:$0xff] %v1733_v28  ;;  %v1351_v52 = vpop.f32.mrf.mxu0 }
 0x1bd   : > { %v1602_v31 = vmul.f32 %v3072_v27, %v1505_v10  ;;  %1571 = vmatmul.f32.gmra.mxu1 %v2777_v17  ;;  %v3482_v17 = vand.u32 4294901760, %v3480_v59  ;;  %v3489_v59 = vld [vmem:[#allocation22_spill] sm:$0xff] }
 0x1be   : > { %v915_v51 = vpop.f32.mrf.mxu2  ;;  %v1116_v13 = vpop.f32.mrf.mxu3 }
 0x1bf   : > { %v1638_v47 = vadd.f32 %v3079_v56, %v1602_v31  ;;  %v1117_v26 = vadd.f32 %v1116_v13, %v911_v45  ;;  %1414 = vmatmul.f32.gmra.mxu0 %v2803_v16  ;;  %v916_v63 = vadd.f32 %v915_v51, %v725_v34 }
 0x1c1   : > { %vm1670_vm11 = vcmp.ge.f32.partialorder %v1638_v47, 0.0  ;;  %v1702_v20 = vmul.f32 0.01, %v1638_v47  ;;  %v1348_v49 = vadd.f32 %v1347_v4, %v1117_v26  ;;  %v3488_v4 = vand.u32 4294901760, %v3483_v55 }
 0x1c2   : > { %v1512_v35 = vpop.f32.mrf.mxu1 }
 0x1c3   : > { %v1734_v39 = vsel %vm1670_vm11, %v1638_v47, %v1702_v20  ;;  %v1509_v3 = vadd.f32 %v1508_v23, %v1348_v49  ;;  %999 = vmatmul.f32.gmra.mxu2 %v2832_v41  ;;  %1217 = vmatmul.f32.gmra.mxu3 %v3482_v17 }
 0x1c4   : > { %1766 = vst [vmem:[%s3095_s23 + $0x58] sm:$0xff] %v1734_v39  ;;  %v1355_v36 = vpop.f32.mrf.mxu0  ;;  %v3490_v39 = vld [vmem:[#allocation23_spill] sm:$0xff] }
 0x1c5   : > { %v1603_v21 = vmul.f32 %v3072_v27, %v1509_v3  ;;  %1575 = vmatmul.f32.gmra.mxu1 %v2803_v16  ;;  %v3484_v16 = vand.u32 4294901760, %v2832_v41 }
 0x1c6   : > { %v920_v18 = vpop.f32.mrf.mxu2  ;;  %v1122_v29 = vpop.f32.mrf.mxu3 }
 0x1c7   : > { %v1639_v50 = vadd.f32 %v3079_v56, %v1603_v21  ;;  %v1123_v38 = vadd.f32 %v1122_v29, %v916_v63  ;;  %1418 = vmatmul.f32.gmra.mxu0 %v2821_v5  ;;  %v921_v30 = vadd.f32 %v920_v18, %v729_v62  ;;  %v3491_v62 = vld [vmem:[#allocation24_spill] sm:$0xff] }
 0x1c9   : > { %vm1671_vm12 = vcmp.ge.f32.partialorder %v1639_v50, 0.0  ;;  %v1703_v60 = vmul.f32 0.01, %v1639_v50  ;;  %v1352_v9 = vadd.f32 %v1351_v52, %v1123_v38 }
 0x1ca   : > { %v1516_v11 = vpop.f32.mrf.mxu1 }
 0x1cb   : > { %v1735_v48 = vsel %vm1671_vm12, %v1639_v50, %v1703_v60  ;;  %v1513_v42 = vadd.f32 %v1512_v35, %v1352_v9  ;;  %1004 = vmatmul.f32.gmra.mxu2 %v3483_v55  ;;  %1223 = vmatmul.f32.gmra.mxu3 %v3484_v16 }
 0x1cc   : > { %1767 = vst [vmem:[%s3095_s23 + $0x60] sm:$0xff] %v1735_v48  ;;  %v1359_v0 = vpop.f32.mrf.mxu0 }
 0x1cd   : > { %v1604_v2 = vmul.f32 %v3072_v27, %v1513_v42  ;;  %1579 = vmatmul.f32.gmra.mxu1 %v2821_v5 }
 0x1ce   : > { %v925_v22 = vpop.f32.mrf.mxu2  ;;  %v1128_v53 = vpop.f32.mrf.mxu3 }
 0x1cf   : > { %v1640_v54 = vadd.f32 %v3079_v56, %v1604_v2  ;;  %v1129_v58 = vadd.f32 %v1128_v53, %v921_v30  ;;  %1422 = vmatmul.f32.gmra.mxu0 %v3485_v40  ;;  %v926_v43 = vadd.f32 %v925_v22, %v733_v15 }
 0x1d1   : > { %vm1672_vm13 = vcmp.ge.f32.partialorder %v1640_v54, 0.0  ;;  %v1704_v33 = vmul.f32 0.01, %v1640_v54  ;;  %v1356_v44 = vadd.f32 %v1355_v36, %v1129_v58 }
 0x1d2   : > { %v1520_v41 = vpop.f32.mrf.mxu1 }
 0x1d3   : > { %v1736_v6 = vsel %vm1672_vm13, %v1640_v54, %v1704_v33  ;;  %v1517_v1 = vadd.f32 %v1516_v11, %v1356_v44  ;;  %1229 = vmatmul.f32.gmra.mxu3 %v3488_v4  ;;  %v3492_v33 = vld [vmem:[#allocation25_spill] sm:$0xff] }
 0x1d4   : > { %1768 = vst [vmem:[%s3095_s23 + $0x68] sm:$0xff] %v1736_v6  ;;  %v1363_v5 = vpop.f32.mrf.mxu0 }
 0x1d5   : > { %v1605_v46 = vmul.f32 %v3072_v27, %v1517_v1  ;;  %1583 = vmatmul.f32.gmra.mxu1 %v3485_v40 }
 0x1d6   : > { %v930_v12 = vpop.f32.mrf.mxu2  ;;  %v1134_v32 = vpop.f32.mrf.mxu3 }
 0x1d7   : > { %v1641_v25 = vadd.f32 %v3079_v56, %v1605_v46  ;;  %v1135_v24 = vadd.f32 %v1134_v32, %v926_v43  ;;  %v931_v8 = vadd.f32 %v930_v12, %v3489_v59  ;;  %v3493_v32 = vld [vmem:[#allocation26_spill] sm:$0xff] }
 0x1d9   : > { %vm1673_vm14 = vcmp.ge.f32.partialorder %v1641_v25, 0.0  ;;  %v1705_v37 = vmul.f32 0.01, %v1641_v25  ;;  %v1360_v61 = vadd.f32 %v1359_v0, %v1135_v24 }
 0x1da   : > { %v1524_v23 = vpop.f32.mrf.mxu1 }
 0x1db   : > { %v1737_v19 = vsel %vm1673_vm14, %v1641_v25, %v1705_v37  ;;  %v1521_v28 = vadd.f32 %v1520_v41, %v1360_v61 }
 0x1dc   : > { %1769 = vst [vmem:[%s3095_s23 + $0x70] sm:$0xff] %v1737_v19  ;;  %v1367_v10 = vpop.f32.mrf.mxu0 }
 0x1dd   : > { %v1606_v52 = vmul.f32 %v3072_v27, %v1521_v28 }
 0x1de   : > { %v935_v45 = vpop.f32.mrf.mxu2  ;;  %v1140_v31 = vpop.f32.mrf.mxu3 }
 0x1df   : > { %v1642_v51 = vadd.f32 %v3079_v56, %v1606_v52  ;;  %v1141_v13 = vadd.f32 %v1140_v31, %v931_v8  ;;  %v936_v3 = vadd.f32 %v935_v45, %v3490_v39  ;;  %v3494_v31 = vld [vmem:[#allocation27_spill] sm:$0xff] }
 0x1e1   : > { %vm1674_vm15 = vcmp.ge.f32.partialorder %v1642_v51, 0.0  ;;  %v1706_v47 = vmul.f32 0.01, %v1642_v51  ;;  %v1364_v26 = vadd.f32 %v1363_v5, %v1141_v13 }
 0x1e2   : > { %v1528_v20 = vpop.f32.mrf.mxu1 }
 0x1e3   : > { %v1738_v49 = vsel %vm1674_vm15, %v1642_v51, %v1706_v47  ;;  %v1525_v35 = vadd.f32 %v1524_v23, %v1364_v26 }
 0x1e4   : > { %1770 = vst [vmem:[%s3095_s23 + $0x78] sm:$0xff] %v1738_v49  ;;  %v1371_v34 = vpop.f32.mrf.mxu0 }
 0x1e5   : > { %v1607_v17 = vmul.f32 %v3072_v27, %v1525_v35 }
 0x1e6   : > { %v940_v36 = vpop.f32.mrf.mxu2  ;;  %v1146_v63 = vpop.f32.mrf.mxu3 }
 0x1e7   : > { %v1643_v21 = vadd.f32 %v3079_v56, %v1607_v17  ;;  %v1147_v18 = vadd.f32 %v1146_v63, %v936_v3  ;;  %v941_v48 = vadd.f32 %v940_v36, %v3491_v62  ;;  %v3495_v63 = vld [vmem:[#allocation28_spill] sm:$0xff] }
 0x1e9   : > { %vm1675_vm0 = vcmp.ge.f32.partialorder %v1643_v21, 0.0  ;;  %v1707_v29 = vmul.f32 0.01, %v1643_v21  ;;  %v1368_v50 = vadd.f32 %v1367_v10, %v1147_v18 }
 0x1ea   : > { %v1532_v38 = vpop.f32.mrf.mxu1 }
 0x1eb   : > { %v1739_v60 = vsel %vm1675_vm0, %v1643_v21, %v1707_v29  ;;  %v1529_v9 = vadd.f32 %v1528_v20, %v1368_v50 }
 0x1ec   : > { %1771 = vst [vmem:[%s3095_s23 + $0x80] sm:$0xff] %v1739_v60  ;;  %v1375_v11 = vpop.f32.mrf.mxu0 }
 0x1ed   : > { %v1608_v42 = vmul.f32 %v3072_v27, %v1529_v9 }
 0x1ee   : > { %v945_v55 = vpop.f32.mrf.mxu2  ;;  %v1152_v16 = vpop.f32.mrf.mxu3 }
 0x1ef   : > { %v1644_v0 = vadd.f32 %v3079_v56, %v1608_v42  ;;  %v1153_v30 = vadd.f32 %v1152_v16, %v941_v48  ;;  %v946_v44 = vadd.f32 %v945_v55, %v3492_v33  ;;  %v3496_v16 = vld [vmem:[#allocation29_spill] sm:$0xff] }
 0x1f1   : > { %vm1676_vm1 = vcmp.ge.f32.partialorder %v1644_v0, 0.0  ;;  %v1708_v2 = vmul.f32 0.01, %v1644_v0  ;;  %v1372_v22 = vadd.f32 %v1371_v34, %v1153_v30 }
 0x1f2   : > { %v1536_v53 = vpop.f32.mrf.mxu1 }
 0x1f3   : > { %v1740_v54 = vsel %vm1676_vm1, %v1644_v0, %v1708_v2  ;;  %v1533_v58 = vadd.f32 %v1532_v38, %v1372_v22 }
 0x1f4   : > { %1772 = vst [vmem:[%s3095_s23 + $0x88] sm:$0xff] %v1740_v54  ;;  %v1379_v40 = vpop.f32.mrf.mxu0 }
 0x1f5   : > { %v1609_v41 = vmul.f32 %v3072_v27, %v1533_v58 }
 0x1f6   : > { %v950_v7 = vpop.f32.mrf.mxu2  ;;  %v1158_v57 = vpop.f32.mrf.mxu3 }
 0x1f7   : > { %v1645_v15 = vadd.f32 %v3079_v56, %v1609_v41  ;;  %v1159_v6 = vadd.f32 %v1158_v57, %v946_v44  ;;  %v951_v25 = vadd.f32 %v950_v7, %v3493_v32  ;;  %v3497_v57 = vld [vmem:[#allocation30_spill] sm:$0xff] }
 0x1f9   : > { %vm1677_vm2 = vcmp.ge.f32.partialorder %v1645_v15, 0.0  ;;  %v1709_v1 = vmul.f32 0.01, %v1645_v15  ;;  %v1376_v4 = vadd.f32 %v1375_v11, %v1159_v6 }
 0x1fa   : > { %v1540_v5 = vpop.f32.mrf.mxu1 }
 0x1fb   : > { %v1741_v43 = vsel %vm1677_vm2, %v1645_v15, %v1709_v1  ;;  %v1537_v46 = vadd.f32 %v1536_v53, %v1376_v4 }
 0x1fc   : > { %1773 = vst [vmem:[%s3095_s23 + $0x90] sm:$0xff] %v1741_v43  ;;  %v1383_v12 = vpop.f32.mrf.mxu0 }
 0x1fd   : > { %v1610_v24 = vmul.f32 %v3072_v27, %v1537_v46 }
 0x1fe   : > { %v955_v37 = vpop.f32.mrf.mxu2  ;;  %v1164_v61 = vpop.f32.mrf.mxu3 }
 0x1ff   : > { %v1646_v23 = vadd.f32 %v3079_v56, %v1610_v24  ;;  %v1165_v19 = vadd.f32 %v1164_v61, %v951_v25  ;;  %v956_v51 = vadd.f32 %v955_v37, %v3494_v31  ;;  %v3498_v61 = vld [vmem:[#allocation31_spill] sm:$0xff] }
 0x201   : > { %vm1678_vm3 = vcmp.ge.f32.partialorder %v1646_v23, 0.0  ;;  %v1710_v28 = vmul.f32 0.01, %v1646_v23  ;;  %v1380_v10 = vadd.f32 %v1379_v40, %v1165_v19 }
 0x202   : > { %v1544_v59 = vpop.f32.mrf.mxu1 }
 0x203   : > { %v1742_v8 = vsel %vm1678_vm3, %v1646_v23, %v1710_v28  ;;  %v1541_v52 = vadd.f32 %v1540_v5, %v1380_v10 }
 0x204   : > { %1774 = vst [vmem:[%s3095_s23 + $0x98] sm:$0xff] %v1742_v8  ;;  %v1387_v45 = vpop.f32.mrf.mxu0 }
 0x205   : > { %v1611_v13 = vmul.f32 %v3072_v27, %v1541_v52 }
 0x206   : > { %v960_v47 = vpop.f32.mrf.mxu2  ;;  %v1170_v26 = vpop.f32.mrf.mxu3 }
 0x207   : > { %v1647_v20 = vadd.f32 %v3079_v56, %v1611_v13  ;;  %v1171_v49 = vadd.f32 %v1170_v26, %v956_v51  ;;  %v961_v21 = vadd.f32 %v960_v47, %v3495_v63  ;;  %v3499_v47 = vld [vmem:[#allocation32_spill] sm:$0xff] }
 0x209   : > { %vm1679_vm4 = vcmp.ge.f32.partialorder %v1647_v20, 0.0  ;;  %v1711_v35 = vmul.f32 0.01, %v1647_v20  ;;  %v1384_v34 = vadd.f32 %v1383_v12, %v1171_v49 }
 0x20a   : > { %v1548_v39 = vpop.f32.mrf.mxu1 }
 0x20b   : > { %v1743_v3 = vsel %vm1679_vm4, %v1647_v20, %v1711_v35  ;;  %v1545_v17 = vadd.f32 %v1544_v59, %v1384_v34 }
 0x20c   : > { %1775 = vst [vmem:[%s3095_s23 + $0xa0] sm:$0xff] %v1743_v3  ;;  %v1391_v36 = vpop.f32.mrf.mxu0 }
 0x20d   : > { %v1612_v18 = vmul.f32 %v3072_v27, %v1545_v17 }
 0x20e   : > { %v965_v29 = vpop.f32.mrf.mxu2  ;;  %v1176_v50 = vpop.f32.mrf.mxu3 }
 0x20f   : > { %v1648_v38 = vadd.f32 %v3079_v56, %v1612_v18  ;;  %v1177_v60 = vadd.f32 %v1176_v50, %v961_v21  ;;  %v966_v0 = vadd.f32 %v965_v29, %v3496_v16  ;;  %v3500_v29 = vld [vmem:[#allocation33_spill] sm:$0xff] }
 0x211   : > { %vm1680_vm5 = vcmp.ge.f32.partialorder %v1648_v38, 0.0  ;;  %v1712_v9 = vmul.f32 0.01, %v1648_v38  ;;  %v1388_v11 = vadd.f32 %v1387_v45, %v1177_v60 }
 0x212   : > { %v1552_v62 = vpop.f32.mrf.mxu1 }
 0x213   : > { %v1744_v48 = vsel %vm1680_vm5, %v1648_v38, %v1712_v9  ;;  %v1549_v42 = vadd.f32 %v1548_v39, %v1388_v11 }
 0x214   : > { %1776 = vst [vmem:[%s3095_s23 + $0xa8] sm:$0xff] %v1744_v48  ;;  %v1395_v55 = vpop.f32.mrf.mxu0 }
 0x215   : > { %v1613_v30 = vmul.f32 %v3072_v27, %v1549_v42 }
 0x216   : > { %v970_v2 = vpop.f32.mrf.mxu2  ;;  %v1182_v22 = vpop.f32.mrf.mxu3 }
 0x217   : > { %v1649_v53 = vadd.f32 %v3079_v56, %v1613_v30  ;;  %v1183_v54 = vadd.f32 %v1182_v22, %v966_v0  ;;  %v971_v15 = vadd.f32 %v970_v2, %v3497_v57  ;;  %v3501_v2 = vld [vmem:[#allocation34_spill] sm:$0xff] }
 0x219   : > { %vm1681_vm6 = vcmp.ge.f32.partialorder %v1649_v53, 0.0  ;;  %v1713_v58 = vmul.f32 0.01, %v1649_v53  ;;  %v1392_v40 = vadd.f32 %v1391_v36, %v1183_v54 }
 0x21a   : > { %v1556_v33 = vpop.f32.mrf.mxu1 }
 0x21b   : > { %v1745_v44 = vsel %vm1681_vm6, %v1649_v53, %v1713_v58  ;;  %v1553_v41 = vadd.f32 %v1552_v62, %v1392_v40 }
 0x21c   : > { %1777 = vst [vmem:[%s3095_s23 + $0xb0] sm:$0xff] %v1745_v44  ;;  %v1399_v7 = vpop.f32.mrf.mxu0 }
 0x21d   : > { %v1614_v6 = vmul.f32 %v3072_v27, %v1553_v41 }
 0x21e   : > { %v975_v1 = vpop.f32.mrf.mxu2  ;;  %v1188_v4 = vpop.f32.mrf.mxu3 }
 0x21f   : > { %v1650_v5 = vadd.f32 %v3079_v56, %v1614_v6  ;;  %v1189_v43 = vadd.f32 %v1188_v4, %v971_v15  ;;  %v976_v23 = vadd.f32 %v975_v1, %v3498_v61  ;;  %v3502_v1 = vld [vmem:[#allocation35_spill] sm:$0xff] }
 0x221   : > { %vm1682_vm7 = vcmp.ge.f32.partialorder %v1650_v5, 0.0  ;;  %v1714_v46 = vmul.f32 0.01, %v1650_v5  ;;  %v1396_v12 = vadd.f32 %v1395_v55, %v1189_v43 }
 0x222   : > { %v1560_v32 = vpop.f32.mrf.mxu1 }
 0x223   : > { %v1746_v25 = vsel %vm1682_vm7, %v1650_v5, %v1714_v46  ;;  %v1557_v24 = vadd.f32 %v1556_v33, %v1396_v12 }
 0x224   : > { %1778 = vst [vmem:[%s3095_s23 + $0xb8] sm:$0xff] %v1746_v25  ;;  %v1403_v37 = vpop.f32.mrf.mxu0 }
 0x225   : > { %v1615_v19 = vmul.f32 %v3072_v27, %v1557_v24 }
 0x226   : > { %v980_v28 = vpop.f32.mrf.mxu2  ;;  %v1194_v10 = vpop.f32.mrf.mxu3 }
 0x227   : > { %v1651_v59 = vadd.f32 %v3079_v56, %v1615_v19  ;;  %v1195_v8 = vadd.f32 %v1194_v10, %v976_v23  ;;  %v981_v26 = vadd.f32 %v980_v28, %v3499_v47  ;;  %v3503_v19 = vld [vmem:[#allocation37_spill] sm:$0xff] }
 0x229   : > { %vm1683_vm8 = vcmp.ge.f32.partialorder %v1651_v59, 0.0  ;;  %v1715_v52 = vmul.f32 0.01, %v1651_v59  ;;  %v1400_v45 = vadd.f32 %v1399_v7, %v1195_v8 }
 0x22a   : > { %v1564_v31 = vpop.f32.mrf.mxu1 }
 0x22b   : > { %v1747_v51 = vsel %vm1683_vm8, %v1651_v59, %v1715_v52  ;;  %v1561_v13 = vadd.f32 %v1560_v32, %v1400_v45 }
 0x22c   : > { %1779 = vst [vmem:[%s3095_s23 + $0xc0] sm:$0xff] %v1747_v51  ;;  %v1407_v49 = vpop.f32.mrf.mxu0 }
 0x22d   : > { %v1616_v20 = vmul.f32 %v3072_v27, %v1561_v13 }
 0x22e   : > { %v985_v35 = vpop.f32.mrf.mxu2  ;;  %v1200_v34 = vpop.f32.mrf.mxu3 }
 0x22f   : > { %v1652_v39 = vadd.f32 %v3079_v56, %v1616_v20  ;;  %v1201_v3 = vadd.f32 %v1200_v34, %v981_v26  ;;  %v986_v50 = vadd.f32 %v985_v35, %v3500_v29 }
 0x231   : > { %vm1684_vm9 = vcmp.ge.f32.partialorder %v1652_v39, 0.0  ;;  %v1716_v17 = vmul.f32 0.01, %v1652_v39  ;;  %v1404_v36 = vadd.f32 %v1403_v37, %v1201_v3 }
 0x232   : > { %v1568_v63 = vpop.f32.mrf.mxu1 }
 0x233   : > { %v1748_v21 = vsel %vm1684_vm9, %v1652_v39, %v1716_v17  ;;  %v1565_v18 = vadd.f32 %v1564_v31, %v1404_v36 }
 0x234   : > { %1780 = vst [vmem:[%s3095_s23 + $0xc8] sm:$0xff] %v1748_v21  ;;  %v1411_v48 = vpop.f32.mrf.mxu0 }
 0x235   : > { %v1617_v38 = vmul.f32 %v3072_v27, %v1565_v18 }
 0x236   : > { %v990_v60 = vpop.f32.mrf.mxu2  ;;  %v1206_v9 = vpop.f32.mrf.mxu3 }
 0x237   : > { %v1653_v11 = vadd.f32 %v3079_v56, %v1617_v38  ;;  %v1207_v62 = vadd.f32 %v1206_v9, %v986_v50  ;;  %v991_v22 = vadd.f32 %v990_v60, %v3501_v2 }
 0x239   : > { %vm1685_vm10 = vcmp.ge.f32.partialorder %v1653_v11, 0.0  ;;  %v1717_v42 = vmul.f32 0.01, %v1653_v11  ;;  %v1408_v55 = vadd.f32 %v1407_v49, %v1207_v62 }
 0x23a   : > { %v1572_v16 = vpop.f32.mrf.mxu1 }
 0x23b   : > { %v1749_v0 = vsel %vm1685_vm10, %v1653_v11, %v1717_v42  ;;  %v1569_v30 = vadd.f32 %v1568_v63, %v1408_v55 }
 0x23c   : > { %1781 = vst [vmem:[%s3095_s23 + $0xd0] sm:$0xff] %v1749_v0  ;;  %v1415_v7 = vpop.f32.mrf.mxu0 }
 0x23d   : > { %v1618_v53 = vmul.f32 %v3072_v27, %v1569_v30 }
 0x23e   : > { %v995_v54 = vpop.f32.mrf.mxu2  ;;  %v1212_v58 = vpop.f32.mrf.mxu3 }
 0x23f   : > { %v1654_v40 = vadd.f32 %v3079_v56, %v1618_v53  ;;  %v1213_v33 = vadd.f32 %v1212_v58, %v991_v22  ;;  %v996_v4 = vadd.f32 %v995_v54, %v3502_v1 }
 0x241   : > { %vm1686_vm11 = vcmp.ge.f32.partialorder %v1654_v40, 0.0  ;;  %v1718_v44 = vmul.f32 0.01, %v1654_v40  ;;  %v1412_v41 = vadd.f32 %v1411_v48, %v1213_v33 }
 0x242   : > { %v1576_v6 = vpop.f32.mrf.mxu1 }
 0x243   : > { %v1750_v57 = vsel %vm1686_vm11, %v1654_v40, %v1718_v44  ;;  %v1573_v15 = vadd.f32 %v1572_v16, %v1412_v41 }
 0x244   : > { %1782 = vst [vmem:[%s3095_s23 + $0xd8] sm:$0xff] %v1750_v57  ;;  %v1419_v23 = vpop.f32.mrf.mxu0 }
 0x245   : > { %v1619_v5 = vmul.f32 %v3072_v27, %v1573_v15 }
 0x246   : > { %v1218_v43 = vpop.f32.mrf.mxu3  ;;  %v1000_v32 = vpop.f32.mrf.mxu2 }
 0x247   : > { %v1655_v46 = vadd.f32 %v3079_v56, %v1619_v5  ;;  %v1219_v12 = vadd.f32 %v1218_v43, %v996_v4  ;;  %v1001_v28 = vadd.f32 %v1000_v32, %v3503_v19 }
 0x249   : > { %vm1687_vm12 = vcmp.ge.f32.partialorder %v1655_v46, 0.0  ;;  %v1719_v25 = vmul.f32 0.01, %v1655_v46  ;;  %v1416_v24 = vadd.f32 %v1415_v7, %v1219_v12 }
 0x24a   : > { %v1580_v8 = vpop.f32.mrf.mxu1 }
 0x24b   : > { %v1751_v37 = vsel %vm1687_vm12, %v1655_v46, %v1719_v25  ;;  %v1577_v61 = vadd.f32 %v1576_v6, %v1416_v24 }
 0x24c   : > { %1783 = vst [vmem:[%s3095_s23 + $0xe0] sm:$0xff] %v1751_v37  ;;  %v1423_v34 = vpop.f32.mrf.mxu0 }
 0x24d   : > { %v1620_v10 = vmul.f32 %v3072_v27, %v1577_v61 }
 0x24e   : > { %v1224_v59 = vpop.f32.mrf.mxu3  ;;  %v1005_v13 = vpop.f32.mrf.mxu2 }
 0x24f   : > { %v1656_v52 = vadd.f32 %v3079_v56, %v1620_v10  ;;  %v1225_v45 = vadd.f32 %v1224_v59, %v1001_v28  ;;  %v1006_v20 = vadd.f32 %v1005_v13, %v3059_v14 }
 0x251   : > { %vm1688_vm13 = vcmp.ge.f32.partialorder %v1656_v52, 0.0  ;;  %v1720_v31 = vmul.f32 0.01, %v1656_v52  ;;  %v1420_v51 = vadd.f32 %v1419_v23, %v1225_v45 }
 0x252   : > { %v1584_v17 = vpop.f32.mrf.mxu1 }
 0x253   : > { %v1752_v47 = vsel %vm1688_vm13, %v1656_v52, %v1720_v31  ;;  %v1581_v26 = vadd.f32 %v1580_v8, %v1420_v51 }
 0x254   : > { %1784 = vst [vmem:[%s3095_s23 + $0xe8] sm:$0xff] %v1752_v47 }
 0x255   : > { %v1621_v49 = vmul.f32 %v3072_v27, %v1581_v26 }
 0x256   : > { %v1230_v35 = vpop.f32.mrf.mxu3 }
 0x257   : > { %v1657_v39 = vadd.f32 %v3079_v56, %v1621_v49  ;;  %v1231_v3 = vadd.f32 %v1230_v35, %v1006_v20 }
 0x259   : > { %vm1689_vm14 = vcmp.ge.f32.partialorder %v1657_v39, 0.0  ;;  %v1721_v36 = vmul.f32 0.01, %v1657_v39  ;;  %v1424_v63 = vadd.f32 %v1423_v34, %v1231_v3 }
 0x25b   : > { %v1753_v21 = vsel %vm1689_vm14, %v1657_v39, %v1721_v36  ;;  %v1585_v18 = vadd.f32 %v1584_v17, %v1424_v63 }
 0x25c   : > { %1785 = vst [vmem:[%s3095_s23 + $0xf0] sm:$0xff] %v1753_v21 }
 0x25d   : > { %v1622_v14 = vmul.f32 %v3072_v27, %v1585_v18 }
 0x25f   : > { %v1658_v29 = vadd.f32 %v3079_v56, %v1622_v14 }
 0x261   : > { %vm1690_vm15 = vcmp.ge.f32.partialorder %v1658_v29, 0.0  ;;  %v1722_v50 = vmul.f32 0.01, %v1658_v29 }
 0x263   : > { %v1754_v38 = vsel %vm1690_vm15, %v1658_v29, %v1722_v50 }
 0x264   : > { %1786 = vst [vmem:[%s3095_s23 + $0xf8] sm:$0xff] %v1754_v38 }
 0x265   : > { %2086 = shalt.err (!%p2083_p10)
}
 0x266   : > { %s2134_s10 = smov 128   ;;  %s2135_s30 = smov 8  }
 0x267   : > { %1942 = dma.vmem_to_hbm [thread:$0]  (%p2230_p3), %s1801_s13, 4096, %s1803_s12, %s1788_s19, %s2134_s10, %s2134_s10, %s2135_s30  }
 0x268 PF: > { %s1817_s5 = sand.u32 1, %s2117_s15   ;;  %p3504_p12 = scmp.ge.s32.totalorder %s2129_s18, 2 }
 0x269   : > { %s1818_s23 = scalar_lea.sflag [#allocation4], %s1817_s5 }
 0x26a   : > { %p1953_p13 = pnand %p3504_p12, %p2196_p6 }
 0x26c   : > { %p1954_p0 = pneg %p1953_p13 }
 0x26e   : > { %2112 = dma.done.wait (%p1954_p0), %s1818_s23, 4096  }
 0x26f   : > { %2114 = vsyncadd (%p1954_p0), %s1818_s23, 4294963200  ;;  %p18_p5 = scmp.ge.s32.totalorder %s2214_s29, 4   ;;  %s3505_s15 = smov %s2121_s16 }
 0x270   : > { %s3506_s16 = smov %s2125_s17  ;;  %s3507_s17 = smov %s2226_s8 }
 0x271   : > { %s3508_s18 = smov %s2214_s29  ;;  %20 = sbr.rel (!%p18_p5) target bundleno = 6 (0x6), region = 85 }
 0x276   :  { %1824 = vsyncpa [#allocation3], 1 }
 0x277   :  { %1826 = vsyncpa [#allocation3 + $0x1], 1 }
 0x278   :  { %1827 = vsyncpa [#allocation6], 1 }
 0x279   :  { %1828 = vsyncpa [#allocation4], 1 }
 0x27a   :  { %1830 = vsyncpa [#allocation4 + $0x1], 1 }

</bundles_post_ra>
